<compile_context>
chip_gen: v7x
topology: tpu7x:2x2x1
jax: 0.10.0
libtpu: 0.0.40
codegen_flags: <defaults>
</compile_context>

<pallas_src>
import functools

import jax
import jax.numpy as jnp
from jax import lax
from jax.experimental import pallas as pl
from jax.experimental.pallas import tpu as pltpu


def _round_up(x, m):
    return (x + m - 1) // m * m


# ---------------------------------------------------------------------------
# Pallas kernel: fused  out = act(A @ W + b), gridded over (M, K)
# ---------------------------------------------------------------------------
def _mm_bias_act_kernel(a_ref, w_ref, b_ref, o_ref, acc_ref, *, act):
    @pl.when(pl.program_id(1) == 0)
    def _():
        acc_ref[...] = jnp.zeros_like(acc_ref)

    # bf16 x bf16 on the MXU, f32 accumulation.
    acc_ref[...] += jnp.dot(a_ref[...], w_ref[...],
                            preferred_element_type=jnp.float32)

    @pl.when(pl.program_id(1) == pl.num_programs(1) - 1)
    def _():
        acc = acc_ref[...] + b_ref[...]          # (1, Np) broadcasts over rows
        if act == "relu":
            acc = jnp.maximum(acc, 0.0)
        elif act == "sigmoid":
            acc = jax.nn.sigmoid(acc)
        o_ref[...] = acc.astype(o_ref.dtype)


def matmul_bias_act(a, w, b, act):
    """a: (M, K), w: (K, N), b: (N,)  ->  act(a @ w + b) as (M, N) f32.

    Operands are cast to bf16 (MXU full-rate); accumulation & epilogue in f32.
    Zero padding of rows/cols is exact for matmul+bias+act; padding is sliced
    off afterwards.
    """
    M, K = a.shape
    K2, N = w.shape
    assert K == K2

    # Tile sizes: one lane-dense N tile (Cout-groups <= 256 in this net),
    # M tiled at up to 512 rows, K tiled at up to 512 (reduction grid axis).
    TM = min(512, _round_up(M, 8))
    TK = min(512, _round_up(K, 128))
    Np = _round_up(N, 128)
    Mp = _round_up(M, TM)
    Kp = _round_up(K, TK)

    a_p = jnp.pad(a.astype(jnp.bfloat16), ((0, Mp - M), (0, Kp - K)))
    w_p = jnp.pad(w.astype(jnp.bfloat16), ((0, Kp - K), (0, Np - N)))
    b_p = jnp.pad(b.astype(jnp.float32), (0, Np - N)).reshape(1, Np)

    grid = (Mp // TM, Kp // TK)

    # Per-tile working set (double-buffered inputs + f32 acc + output) is a
    # few MiB at most; 32 MiB is within physical VMEM on v5e/v6e/v7x.
    vmem_limit = 32 * 1024 * 1024

    out = pl.pallas_call(
        functools.partial(_mm_bias_act_kernel, act=act),
        out_shape=jax.ShapeDtypeStruct((Mp, Np), jnp.float32),
        grid_spec=pltpu.PrefetchScalarGridSpec(
            num_scalar_prefetch=0,
            grid=grid,
            in_specs=[
                pl.BlockSpec((TM, TK), lambda i, k: (i, k)),
                pl.BlockSpec((TK, Np), lambda i, k: (k, 0)),
                pl.BlockSpec((1, Np), lambda i, k: (0, 0)),
            ],
            out_specs=pl.BlockSpec((TM, Np), lambda i, k: (i, 0)),
            scratch_shapes=[pltpu.VMEM((TM, Np), jnp.float32)],
        ),
        compiler_params=pltpu.CompilerParams(
            dimension_semantics=("parallel", "arbitrary"),
            vmem_limit_bytes=vmem_limit,
        ),
    )(a_p, w_p, b_p)
    return out[:M, :N]


# ---------------------------------------------------------------------------
# NHWC im2col + conv layers built on the Pallas matmul kernel
# ---------------------------------------------------------------------------
def _im2col_nhwc(x, k, stride, pad):
    """x: (N, H, W, C) -> patches (N*Ho*Wo, k*k*C), feature order (kh, kw, C)."""
    N, H, W, C = x.shape
    xp = jnp.pad(x, ((0, 0), (pad, pad), (pad, pad), (0, 0)))
    Ho = (H + 2 * pad - k) // stride + 1
    Wo = (W + 2 * pad - k) // stride + 1
    cols = []
    for a in range(k):
        for b in range(k):
            cols.append(xp[:, a:a + stride * Ho:stride, b:b + stride * Wo:stride, :])
    patches = jnp.stack(cols, axis=3)                 # (N, Ho, Wo, k*k, C)
    return patches.reshape(N * Ho * Wo, k * k * C), Ho, Wo


def conv2d_nhwc(x, w_mat, b, k, stride, pad, act):
    """x: (N,H,W,Cin); w_mat: (k*k*Cin, Cout) (HWIO-flattened); b: (Cout,)."""
    N = x.shape[0]
    Cout = w_mat.shape[1]
    patches, Ho, Wo = _im2col_nhwc(x, k, stride, pad)
    y = matmul_bias_act(patches, w_mat, b, act)       # (N*Ho*Wo, Cout)
    return y.reshape(N, Ho, Wo, Cout)


def conv_transpose2d_nhwc(x, w_mat, b4, act):
    """ConvTranspose2d(k=4, stride=2, pad=1) via sub-pixel decomposition.

    x: (N,H,W,Cin); w_mat: (9*Cin, 4*Cout) phase-expanded weight matrix;
    b4: (4*Cout,) = tile(bias, 4).  Output: (N, 2H, 2W, Cout).
    """
    N, H, W, Cin = x.shape
    Cout = w_mat.shape[1] // 4
    patches, _, _ = _im2col_nhwc(x, 3, 1, 1)          # (N*H*W, 9*Cin)
    y = matmul_bias_act(patches, w_mat, b4, act)      # (N*H*W, 4*Cout)
    y = y.reshape(N, H, W, 2, 2, Cout)                # (n, i, j, r, c, co)
    y = y.transpose(0, 1, 3, 2, 4, 5).reshape(N, 2 * H, 2 * W, Cout)
    return y


# ---------------------------------------------------------------------------
# Parameter preparation (done once, outside the hot path)
# ---------------------------------------------------------------------------
def _conv_weight_matrix(w):
    """PyTorch Conv2d weight (Cout, Cin, k, k) -> (k*k*Cin, Cout)."""
    Cout, Cin, k, _ = w.shape
    return w.transpose(2, 3, 1, 0).reshape(k * k * Cin, Cout)


def _convtranspose_weight_matrix(w):
    """PyTorch ConvTranspose2d weight (Cin, Cout, 4, 4), stride=2, pad=1
    -> phase-expanded matrix (9*Cin, 4*Cout).

    Output phase (r, c) at position (i, j) reads the 3x3 (pad=1) neighbourhood
    of the input; patch offset a maps to kernel tap kh = 3 - 2a + r (taps
    outside [0,3] contribute zero).  Columns are ordered (r, c, co).
    """
    Cin, Cout, k, _ = w.shape
    assert k == 4
    tap = {(0, 0): 3, (0, 1): 1, (1, 1): 2, (1, 2): 0}   # (phase, offset) -> tap
    Wm = jnp.zeros((3, 3, Cin, 2, 2, Cout), w.dtype)
    for (r, a), kh in tap.items():
        for (c, b), kw in tap.items():
            Wm = Wm.at[a, b, :, r, c, :].set(w[:, :, kh, kw])
    return Wm.reshape(9 * Cin, 4 * Cout)


def prepare_params(params):
    """Convert PyTorch-layout params into matmul-ready matrices (hoisted)."""
    return {
        "enc1_w": _conv_weight_matrix(params["enc1_w"]), "enc1_b": params["enc1_b"],
        "enc2_w": _conv_weight_matrix(params["enc2_w"]), "enc2_b": params["enc2_b"],
        "enc3_w": _conv_weight_matrix(params["enc3_w"]), "enc3_b": params["enc3_b"],
        "dec1_w": _convtranspose_weight_matrix(params["dec1_w"]),
        "dec1_b": jnp.tile(params["dec1_b"], 4),
        "dec2_w": _convtranspose_weight_matrix(params["dec2_w"]),
        "dec2_b": jnp.tile(params["dec2_b"], 4),
        "dec3_w": _convtranspose_weight_matrix(params["dec3_w"]),
        "dec3_b": jnp.tile(params["dec3_b"], 4),
    }


# ---------------------------------------------------------------------------
# Model
# ---------------------------------------------------------------------------
def init_params(key):
    keys = jax.random.split(key, 12)

    def w_init(k, shape, fan_in):
        return jax.random.normal(k, shape, jnp.float32) / jnp.sqrt(float(fan_in))

    def b_init(k, shape):
        return 0.01 * jax.random.normal(k, shape, jnp.float32)

    return {
        # encoder: Conv2d weights are (Cout, Cin, 5, 5)
        "enc1_w": w_init(keys[0], (32, 3, 5, 5), 3 * 25),    "enc1_b": b_init(keys[1], (32,)),
        "enc2_w": w_init(keys[2], (64, 32, 5, 5), 32 * 25),  "enc2_b": b_init(keys[3], (64,)),
        "enc3_w": w_init(keys[4], (128, 64, 5, 5), 64 * 25), "enc3_b": b_init(keys[5], (128,)),
        # decoder: ConvTranspose2d weights are (Cin, Cout, 4, 4)
        "dec1_w": w_init(keys[6], (128, 64, 4, 4), 128 * 16), "dec1_b": b_init(keys[7], (64,)),
        "dec2_w": w_init(keys[8], (64, 32, 4, 4), 64 * 16),  "dec2_b": b_init(keys[9], (32,)),
        "dec3_w": w_init(keys[10], (32, 1, 4, 4), 32 * 16),  "dec3_b": b_init(keys[11], (1,)),
    }


def simple_depth_cnn_forward(prepped, x_nchw):
    # NCHW (PyTorch convention) -> NHWC at the boundary only.
    x = x_nchw.transpose(0, 2, 3, 1)
    # encoder
    x = conv2d_nhwc(x, prepped["enc1_w"], prepped["enc1_b"], 5, 2, 2, "relu")
    x = conv2d_nhwc(x, prepped["enc2_w"], prepped["enc2_b"], 5, 2, 2, "relu")
    x = conv2d_nhwc(x, prepped["enc3_w"], prepped["enc3_b"], 5, 2, 2, "relu")
    # decoder (sub-pixel transposed convs)
    x = conv_transpose2d_nhwc(x, prepped["dec1_w"], prepped["dec1_b"], "relu")
    x = conv_transpose2d_nhwc(x, prepped["dec2_w"], prepped["dec2_b"], "relu")
    x = conv_transpose2d_nhwc(x, prepped["dec3_w"], prepped["dec3_b"], "sigmoid")
    return x.transpose(0, 3, 1, 2)   # back to NCHW


# ---------------------------------------------------------------------------
# Pure-XLA reference (correctness check only; uses PyTorch-layout params)
# ---------------------------------------------------------------------------
def reference_forward(params, x):
    dn = ("NCHW", "OIHW", "NCHW")

    def conv(x, w, b, s, p):
        y = lax.conv_general_dilated(x, w, (s, s), [(p, p), (p, p)], dimension_numbers=dn)
        return y + b[None, :, None, None]

    def convt(x, w, b, s, p):
        k = w.shape[2]
        w_eq = jnp.flip(w, axis=(2, 3)).transpose(1, 0, 2, 3)
        y = lax.conv_general_dilated(x, w_eq, (1, 1), [(k - 1 - p,) * 2] * 2,
                                     lhs_dilation=(s, s), dimension_numbers=dn)
        return y + b[None, :, None, None]

    x = jax.nn.relu(conv(x, params["enc1_w"], params["enc1_b"], 2, 2))
    x = jax.nn.relu(conv(x, params["enc2_w"], params["enc2_b"], 2, 2))
    x = jax.nn.relu(conv(x, params["enc3_w"], params["enc3_b"], 2, 2))
    x = jax.nn.relu(convt(x, params["dec1_w"], params["dec1_b"], 2, 1))
    x = jax.nn.relu(convt(x, params["dec2_w"], params["dec2_b"], 2, 1))
    x = jax.nn.sigmoid(convt(x, params["dec3_w"], params["dec3_b"], 2, 1))
    return x


if __name__ == "__main__":
    key = jax.random.PRNGKey(0)
    k_param, k_x = jax.random.split(key)
    params = init_params(k_param)
    prepped = prepare_params(params)   # weight preprocessing hoisted (once)

    # NCHW input, RGB image 16x16 (16 = 2^4 so the encoder/decoder round-trips)
    x = jax.random.normal(k_x, (2, 3, 16, 16), jnp.float32)

    fwd = jax.jit(simple_depth_cnn_forward)
    out = jax.block_until_ready(fwd(prepped, x))
    assert out.shape == (2, 1, 16, 16), out.shape
    assert out.dtype == jnp.float32

    ref = jax.block_until_ready(reference_forward(params, x))
    # bf16 MXU operands with f32 accumulation -> slightly looser tolerance.
    err = float(jnp.max(jnp.abs(out - ref)))
    assert jnp.allclose(out, ref, atol=2e-2, rtol=2e-2), err

    print("KERNEL_OK")
</pallas_src>

<mosaic_0001>
module attributes {stable_mosaic.version = 11 : i64} {
  func.func @_mm_bias_act_kernel(%arg0: i32, %arg1: i32, %arg2: memref<128x128xbf16, #tpu.memory_space<vmem>>, %arg3: memref<128x128xbf16, #tpu.memory_space<vmem>>, %arg4: memref<1x128xf32, #tpu.memory_space<vmem>>, %arg5: memref<128x128xf32, #tpu.memory_space<vmem>>, %arg6: memref<128x128xf32, #tpu.memory_space<vmem>>) attributes {dimension_semantics = [#tpu.dimension_semantics<parallel>, #tpu.dimension_semantics<arbitrary>], iteration_bounds = array<i64: 1, 1>, scalar_prefetch = 0 : i64, scratch_operands = 1 : i64, tpu.core_type = #tpu.core_type<tc>, window_params = [{transform_indices = @transform_0, window_bounds = array<i64: 128, 128>}, {transform_indices = @transform_1, window_bounds = array<i64: 128, 128>}, {pipeline_mode = #tpu.pipeline_mode<synchronous>, transform_indices = @transform_2, window_bounds = array<i64: 1, 128>}, {transform_indices = @transform_3, window_bounds = array<i64: 128, 128>}]} {
    %c0_i32 = arith.constant 0 : i32
    %0 = arith.cmpi eq, %arg1, %c0_i32 : i32
    %1 = arith.extui %0 : i1 to i32
    %c0_i32_0 = arith.constant 0 : i32
    %2 = arith.cmpi ne, %1, %c0_i32_0 : i32
    scf.if %2 {
      %cst_10 = arith.constant 0.000000e+00 : f32
      %12 = vector.broadcast %cst_10 : f32 to vector<128x128xf32>
      %c0_11 = arith.constant 0 : index
      %c0_12 = arith.constant 0 : index
      %13 = vector.load %arg6[%c0_11, %c0_12] : memref<128x128xf32, #tpu.memory_space<vmem>>, vector<128x128xf32>
      tpu.vector_store %arg6[%c0_11, %c0_12], %12 {strides = array<i32>} : memref<128x128xf32, #tpu.memory_space<vmem>>, vector<128x128xf32>,
    } else {
    }
    %c0 = arith.constant 0 : index
    %c0_1 = arith.constant 0 : index
    %3 = vector.load %arg6[%c0, %c0_1] : memref<128x128xf32, #tpu.memory_space<vmem>>, vector<128x128xf32>
    %c0_2 = arith.constant 0 : index
    %c0_3 = arith.constant 0 : index
    %4 = vector.load %arg2[%c0_2, %c0_3] : memref<128x128xbf16, #tpu.memory_space<vmem>>, vector<128x128xbf16>
    %c0_4 = arith.constant 0 : index
    %c0_5 = arith.constant 0 : index
    %5 = vector.load %arg3[%c0_4, %c0_5] : memref<128x128xbf16, #tpu.memory_space<vmem>>, vector<128x128xbf16>
    %cst = arith.constant dense<0.000000e+00> : vector<128x128xf32>
    %6 = tpu.matmul %4, %5, %cst {dimension_numbers = #tpu.dot_dimension_numbers<[1], [0], [0], [1], [0, 0, 1, 1], [], []>} : vector<128x128xbf16>, vector<128x128xbf16>, vector<128x128xf32> -> vector<128x128xf32>
    %7 = arith.addf %3, %6 : vector<128x128xf32>
    %c0_6 = arith.constant 0 : index
    %c0_7 = arith.constant 0 : index
    %8 = vector.load %arg6[%c0_6, %c0_7] : memref<128x128xf32, #tpu.memory_space<vmem>>, vector<128x128xf32>
    tpu.vector_store %arg6[%c0_6, %c0_7], %7 {strides = array<i32>} : memref<128x128xf32, #tpu.memory_space<vmem>>, vector<128x128xf32>,
    %c0_i32_8 = arith.constant 0 : i32
    %9 = arith.cmpi eq, %arg1, %c0_i32_8 : i32
    %10 = arith.extui %9 : i1 to i32
    %c0_i32_9 = arith.constant 0 : i32
    %11 = arith.cmpi ne, %10, %c0_i32_9 : i32
    scf.if %11 {
      %c0_10 = arith.constant 0 : index
      %c0_11 = arith.constant 0 : index
      %12 = vector.load %arg6[%c0_10, %c0_11] : memref<128x128xf32, #tpu.memory_space<vmem>>, vector<128x128xf32>
      %c0_12 = arith.constant 0 : index
      %c0_13 = arith.constant 0 : index
      %13 = vector.load %arg4[%c0_12, %c0_13] : memref<1x128xf32, #tpu.memory_space<vmem>>, vector<1x128xf32>
      %14 = vector.broadcast %13 : vector<1x128xf32> to vector<128x128xf32>
      %15 = arith.addf %12, %14 : vector<128x128xf32>
      %cst_14 = arith.constant 0.000000e+00 : f32
      %16 = vector.broadcast %cst_14 : f32 to vector<128x128xf32>
      %17 = arith.maximumf %15, %16 : vector<128x128xf32>
      %c0_15 = arith.constant 0 : index
      %c0_16 = arith.constant 0 : index
      %18 = vector.load %arg5[%c0_15, %c0_16] : memref<128x128xf32, #tpu.memory_space<vmem>>, vector<128x128xf32>
      tpu.vector_store %arg5[%c0_15, %c0_16], %17 {strides = array<i32>} : memref<128x128xf32, #tpu.memory_space<vmem>>, vector<128x128xf32>,
    } else {
    }
    return
  }
  func.func @transform_0(%arg0: i32, %arg1: i32) -> (i32, i32) {
    %c0_i32 = arith.constant 0 : i32
    return %arg0, %arg1 : i32, i32
  }
  func.func @transform_1(%arg0: i32, %arg1: i32) -> (i32, i32) {
    %c0_i32 = arith.constant 0 : i32
    %c0_i32_0 = arith.constant 0 : i32
    return %arg1, %c0_i32 : i32, i32
  }
  func.func @transform_2(%arg0: i32, %arg1: i32) -> (i32, i32) {
    %c0_i32 = arith.constant 0 : i32
    %c0_i32_0 = arith.constant 0 : i32
    %c0_i32_1 = arith.constant 0 : i32
    return %c0_i32, %c0_i32_0 : i32, i32
  }
  func.func @transform_3(%arg0: i32, %arg1: i32) -> (i32, i32) {
    %c0_i32 = arith.constant 0 : i32
    %c0_i32_0 = arith.constant 0 : i32
    return %arg0, %c0_i32 : i32, i32
  }
}

module attributes {stable_mosaic.version = 11 : i64} {
  func.func @_mm_bias_act_kernel(%arg0: i32, %arg1: i32, %arg2: memref<32x512xbf16, #tpu.memory_space<vmem>>, %arg3: memref<512x128xbf16, #tpu.memory_space<vmem>>, %arg4: memref<1x128xf32, #tpu.memory_space<vmem>>, %arg5: memref<32x128xf32, #tpu.memory_space<vmem>>, %arg6: memref<32x128xf32, #tpu.memory_space<vmem>>) attributes {dimension_semantics = [#tpu.dimension_semantics<parallel>, #tpu.dimension_semantics<arbitrary>], iteration_bounds = array<i64: 1, 2>, scalar_prefetch = 0 : i64, scratch_operands = 1 : i64, tpu.core_type = #tpu.core_type<tc>, window_params = [{transform_indices = @transform_0, window_bounds = array<i64: 32, 512>}, {transform_indices = @transform_1, window_bounds = array<i64: 512, 128>}, {pipeline_mode = #tpu.pipeline_mode<synchronous>, transform_indices = @transform_2, window_bounds = array<i64: 1, 128>}, {transform_indices = @transform_3, window_bounds = array<i64: 32, 128>}]} {
    %c0_i32 = arith.constant 0 : i32
    %0 = arith.cmpi eq, %arg1, %c0_i32 : i32
    %1 = arith.extui %0 : i1 to i32
    %c0_i32_0 = arith.constant 0 : i32
    %2 = arith.cmpi ne, %1, %c0_i32_0 : i32
    scf.if %2 {
      %cst_9 = arith.constant 0.000000e+00 : f32
      %12 = vector.broadcast %cst_9 : f32 to vector<32x128xf32>
      %c0_10 = arith.constant 0 : index
      %c0_11 = arith.constant 0 : index
      %13 = vector.load %arg6[%c0_10, %c0_11] : memref<32x128xf32, #tpu.memory_space<vmem>>, vector<32x128xf32>
      tpu.vector_store %arg6[%c0_10, %c0_11], %12 {strides = array<i32>} : memref<32x128xf32, #tpu.memory_space<vmem>>, vector<32x128xf32>,
    } else {
    }
    %c0 = arith.constant 0 : index
    %c0_1 = arith.constant 0 : index
    %3 = vector.load %arg6[%c0, %c0_1] : memref<32x128xf32, #tpu.memory_space<vmem>>, vector<32x128xf32>
    %c0_2 = arith.constant 0 : index
    %c0_3 = arith.constant 0 : index
    %4 = vector.load %arg2[%c0_2, %c0_3] : memref<32x512xbf16, #tpu.memory_space<vmem>>, vector<32x512xbf16>
    %c0_4 = arith.constant 0 : index
    %c0_5 = arith.constant 0 : index
    %5 = vector.load %arg3[%c0_4, %c0_5] : memref<512x128xbf16, #tpu.memory_space<vmem>>, vector<512x128xbf16>
    %cst = arith.constant dense<0.000000e+00> : vector<32x128xf32>
    %6 = tpu.matmul %4, %5, %cst {dimension_numbers = #tpu.dot_dimension_numbers<[1], [0], [0], [1], [0, 0, 1, 1], [], []>} : vector<32x512xbf16>, vector<512x128xbf16>, vector<32x128xf32> -> vector<32x128xf32>
    %7 = arith.addf %3, %6 : vector<32x128xf32>
    %c0_6 = arith.constant 0 : index
    %c0_7 = arith.constant 0 : index
    %8 = vector.load %arg6[%c0_6, %c0_7] : memref<32x128xf32, #tpu.memory_space<vmem>>, vector<32x128xf32>
    tpu.vector_store %arg6[%c0_6, %c0_7], %7 {strides = array<i32>} : memref<32x128xf32, #tpu.memory_space<vmem>>, vector<32x128xf32>,
    %c1_i32 = arith.constant 1 : i32
    %9 = arith.cmpi eq, %arg1, %c1_i32 : i32
    %10 = arith.extui %9 : i1 to i32
    %c0_i32_8 = arith.constant 0 : i32
    %11 = arith.cmpi ne, %10, %c0_i32_8 : i32
    scf.if %11 {
      %c0_9 = arith.constant 0 : index
      %c0_10 = arith.constant 0 : index
      %12 = vector.load %arg6[%c0_9, %c0_10] : memref<32x128xf32, #tpu.memory_space<vmem>>, vector<32x128xf32>
      %c0_11 = arith.constant 0 : index
      %c0_12 = arith.constant 0 : index
      %13 = vector.load %arg4[%c0_11, %c0_12] : memref<1x128xf32, #tpu.memory_space<vmem>>, vector<1x128xf32>
      %14 = vector.broadcast %13 : vector<1x128xf32> to vector<32x128xf32>
      %15 = arith.addf %12, %14 : vector<32x128xf32>
      %cst_13 = arith.constant 0.000000e+00 : f32
      %16 = vector.broadcast %cst_13 : f32 to vector<32x128xf32>
      %17 = arith.maximumf %15, %16 : vector<32x128xf32>
      %c0_14 = arith.constant 0 : index
      %c0_15 = arith.constant 0 : index
      %18 = vector.load %arg5[%c0_14, %c0_15] : memref<32x128xf32, #tpu.memory_space<vmem>>, vector<32x128xf32>
      tpu.vector_store %arg5[%c0_14, %c0_15], %17 {strides = array<i32>} : memref<32x128xf32, #tpu.memory_space<vmem>>, vector<32x128xf32>,
    } else {
    }
    return
  }
  func.func @transform_0(%arg0: i32, %arg1: i32) -> (i32, i32) {
    %c0_i32 = arith.constant 0 : i32
    return %arg0, %arg1 : i32, i32
  }
  func.func @transform_1(%arg0: i32, %arg1: i32) -> (i32, i32) {
    %c0_i32 = arith.constant 0 : i32
    %c0_i32_0 = arith.constant 0 : i32
    return %arg1, %c0_i32 : i32, i32
  }
  func.func @transform_2(%arg0: i32, %arg1: i32) -> (i32, i32) {
    %c0_i32 = arith.constant 0 : i32
    %c0_i32_0 = arith.constant 0 : i32
    %c0_i32_1 = arith.constant 0 : i32
    return %c0_i32, %c0_i32_0 : i32, i32
  }
  func.func @transform_3(%arg0: i32, %arg1: i32) -> (i32, i32) {
    %c0_i32 = arith.constant 0 : i32
    %c0_i32_0 = arith.constant 0 : i32
    return %arg0, %c0_i32 : i32, i32
  }
}

module attributes {stable_mosaic.version = 11 : i64} {
  func.func @_mm_bias_act_kernel(%arg0: i32, %arg1: i32, %arg2: memref<8x512xbf16, #tpu.memory_space<vmem>>, %arg3: memref<512x128xbf16, #tpu.memory_space<vmem>>, %arg4: memref<1x128xf32, #tpu.memory_space<vmem>>, %arg5: memref<8x128xf32, #tpu.memory_space<vmem>>, %arg6: memref<8x128xf32, #tpu.memory_space<vmem>>) attributes {dimension_semantics = [#tpu.dimension_semantics<parallel>, #tpu.dimension_semantics<arbitrary>], iteration_bounds = array<i64: 1, 4>, scalar_prefetch = 0 : i64, scratch_operands = 1 : i64, tpu.core_type = #tpu.core_type<tc>, window_params = [{transform_indices = @transform_0, window_bounds = array<i64: 8, 512>}, {transform_indices = @transform_1, window_bounds = array<i64: 512, 128>}, {pipeline_mode = #tpu.pipeline_mode<synchronous>, transform_indices = @transform_2, window_bounds = array<i64: 1, 128>}, {transform_indices = @transform_3, window_bounds = array<i64: 8, 128>}]} {
    %c0_i32 = arith.constant 0 : i32
    %0 = arith.cmpi eq, %arg1, %c0_i32 : i32
    %1 = arith.extui %0 : i1 to i32
    %c0_i32_0 = arith.constant 0 : i32
    %2 = arith.cmpi ne, %1, %c0_i32_0 : i32
    scf.if %2 {
      %cst_9 = arith.constant 0.000000e+00 : f32
      %12 = vector.broadcast %cst_9 : f32 to vector<8x128xf32>
      %c0_10 = arith.constant 0 : index
      %c0_11 = arith.constant 0 : index
      %13 = vector.load %arg6[%c0_10, %c0_11] : memref<8x128xf32, #tpu.memory_space<vmem>>, vector<8x128xf32>
      tpu.vector_store %arg6[%c0_10, %c0_11], %12 {strides = array<i32>} : memref<8x128xf32, #tpu.memory_space<vmem>>, vector<8x128xf32>,
    } else {
    }
    %c0 = arith.constant 0 : index
    %c0_1 = arith.constant 0 : index
    %3 = vector.load %arg6[%c0, %c0_1] : memref<8x128xf32, #tpu.memory_space<vmem>>, vector<8x128xf32>
    %c0_2 = arith.constant 0 : index
    %c0_3 = arith.constant 0 : index
    %4 = vector.load %arg2[%c0_2, %c0_3] : memref<8x512xbf16, #tpu.memory_space<vmem>>, vector<8x512xbf16>
    %c0_4 = arith.constant 0 : index
    %c0_5 = arith.constant 0 : index
    %5 = vector.load %arg3[%c0_4, %c0_5] : memref<512x128xbf16, #tpu.memory_space<vmem>>, vector<512x128xbf16>
    %cst = arith.constant dense<0.000000e+00> : vector<8x128xf32>
    %6 = tpu.matmul %4, %5, %cst {dimension_numbers = #tpu.dot_dimension_numbers<[1], [0], [0], [1], [0, 0, 1, 1], [], []>} : vector<8x512xbf16>, vector<512x128xbf16>, vector<8x128xf32> -> vector<8x128xf32>
    %7 = arith.addf %3, %6 : vector<8x128xf32>
    %c0_6 = arith.constant 0 : index
    %c0_7 = arith.constant 0 : index
    %8 = vector.load %arg6[%c0_6, %c0_7] : memref<8x128xf32, #tpu.memory_space<vmem>>, vector<8x128xf32>
    tpu.vector_store %arg6[%c0_6, %c0_7], %7 {strides = array<i32>} : memref<8x128xf32, #tpu.memory_space<vmem>>, vector<8x128xf32>,
    %c3_i32 = arith.constant 3 : i32
    %9 = arith.cmpi eq, %arg1, %c3_i32 : i32
    %10 = arith.extui %9 : i1 to i32
    %c0_i32_8 = arith.constant 0 : i32
    %11 = arith.cmpi ne, %10, %c0_i32_8 : i32
    scf.if %11 {
      %c0_9 = arith.constant 0 : index
      %c0_10 = arith.constant 0 : index
      %12 = vector.load %arg6[%c0_9, %c0_10] : memref<8x128xf32, #tpu.memory_space<vmem>>, vector<8x128xf32>
      %c0_11 = arith.constant 0 : index
      %c0_12 = arith.constant 0 : index
      %13 = vector.load %arg4[%c0_11, %c0_12] : memref<1x128xf32, #tpu.memory_space<vmem>>, vector<1x128xf32>
      %14 = vector.broadcast %13 : vector<1x128xf32> to vector<8x128xf32>
      %15 = arith.addf %12, %14 : vector<8x128xf32>
      %cst_13 = arith.constant 0.000000e+00 : f32
      %16 = vector.broadcast %cst_13 : f32 to vector<8x128xf32>
      %17 = arith.maximumf %15, %16 : vector<8x128xf32>
      %c0_14 = arith.constant 0 : index
      %c0_15 = arith.constant 0 : index
      %18 = vector.load %arg5[%c0_14, %c0_15] : memref<8x128xf32, #tpu.memory_space<vmem>>, vector<8x128xf32>
      tpu.vector_store %arg5[%c0_14, %c0_15], %17 {strides = array<i32>} : memref<8x128xf32, #tpu.memory_space<vmem>>, vector<8x128xf32>,
    } else {
    }
    return
  }
  func.func @transform_0(%arg0: i32, %arg1: i32) -> (i32, i32) {
    %c0_i32 = arith.constant 0 : i32
    return %arg0, %arg1 : i32, i32
  }
  func.func @transform_1(%arg0: i32, %arg1: i32) -> (i32, i32) {
    %c0_i32 = arith.constant 0 : i32
    %c0_i32_0 = arith.constant 0 : i32
    return %arg1, %c0_i32 : i32, i32
  }
  func.func @transform_2(%arg0: i32, %arg1: i32) -> (i32, i32) {
    %c0_i32 = arith.constant 0 : i32
    %c0_i32_0 = arith.constant 0 : i32
    %c0_i32_1 = arith.constant 0 : i32
    return %c0_i32, %c0_i32_0 : i32, i32
  }
  func.func @transform_3(%arg0: i32, %arg1: i32) -> (i32, i32) {
    %c0_i32 = arith.constant 0 : i32
    %c0_i32_0 = arith.constant 0 : i32
    return %arg0, %c0_i32 : i32, i32
  }
}

module attributes {stable_mosaic.version = 11 : i64} {
  func.func @_mm_bias_act_kernel(%arg0: i32, %arg1: i32, %arg2: memref<8x512xbf16, #tpu.memory_space<vmem>>, %arg3: memref<512x256xbf16, #tpu.memory_space<vmem>>, %arg4: memref<1x256xf32, #tpu.memory_space<vmem>>, %arg5: memref<8x256xf32, #tpu.memory_space<vmem>>, %arg6: memref<8x256xf32, #tpu.memory_space<vmem>>) attributes {dimension_semantics = [#tpu.dimension_semantics<parallel>, #tpu.dimension_semantics<arbitrary>], iteration_bounds = array<i64: 1, 3>, scalar_prefetch = 0 : i64, scratch_operands = 1 : i64, tpu.core_type = #tpu.core_type<tc>, window_params = [{transform_indices = @transform_0, window_bounds = array<i64: 8, 512>}, {transform_indices = @transform_1, window_bounds = array<i64: 512, 256>}, {pipeline_mode = #tpu.pipeline_mode<synchronous>, transform_indices = @transform_2, window_bounds = array<i64: 1, 256>}, {transform_indices = @transform_3, window_bounds = array<i64: 8, 256>}]} {
    %c0_i32 = arith.constant 0 : i32
    %0 = arith.cmpi eq, %arg1, %c0_i32 : i32
    %1 = arith.extui %0 : i1 to i32
    %c0_i32_0 = arith.constant 0 : i32
    %2 = arith.cmpi ne, %1, %c0_i32_0 : i32
    scf.if %2 {
      %cst_9 = arith.constant 0.000000e+00 : f32
      %12 = vector.broadcast %cst_9 : f32 to vector<8x256xf32>
      %c0_10 = arith.constant 0 : index
      %c0_11 = arith.constant 0 : index
      %13 = vector.load %arg6[%c0_10, %c0_11] : memref<8x256xf32, #tpu.memory_space<vmem>>, vector<8x256xf32>
      tpu.vector_store %arg6[%c0_10, %c0_11], %12 {strides = array<i32>} : memref<8x256xf32, #tpu.memory_space<vmem>>, vector<8x256xf32>,
    } else {
    }
    %c0 = arith.constant 0 : index
    %c0_1 = arith.constant 0 : index
    %3 = vector.load %arg6[%c0, %c0_1] : memref<8x256xf32, #tpu.memory_space<vmem>>, vector<8x256xf32>
    %c0_2 = arith.constant 0 : index
    %c0_3 = arith.constant 0 : index
    %4 = vector.load %arg2[%c0_2, %c0_3] : memref<8x512xbf16, #tpu.memory_space<vmem>>, vector<8x512xbf16>
    %c0_4 = arith.constant 0 : index
    %c0_5 = arith.constant 0 : index
    %5 = vector.load %arg3[%c0_4, %c0_5] : memref<512x256xbf16, #tpu.memory_space<vmem>>, vector<512x256xbf16>
    %cst = arith.constant dense<0.000000e+00> : vector<8x256xf32>
    %6 = tpu.matmul %4, %5, %cst {dimension_numbers = #tpu.dot_dimension_numbers<[1], [0], [0], [1], [0, 0, 1, 1], [], []>} : vector<8x512xbf16>, vector<512x256xbf16>, vector<8x256xf32> -> vector<8x256xf32>
    %7 = arith.addf %3, %6 : vector<8x256xf32>
    %c0_6 = arith.constant 0 : index
    %c0_7 = arith.constant 0 : index
    %8 = vector.load %arg6[%c0_6, %c0_7] : memref<8x256xf32, #tpu.memory_space<vmem>>, vector<8x256xf32>
    tpu.vector_store %arg6[%c0_6, %c0_7], %7 {strides = array<i32>} : memref<8x256xf32, #tpu.memory_space<vmem>>, vector<8x256xf32>,
    %c2_i32 = arith.constant 2 : i32
    %9 = arith.cmpi eq, %arg1, %c2_i32 : i32
    %10 = arith.extui %9 : i1 to i32
    %c0_i32_8 = arith.constant 0 : i32
    %11 = arith.cmpi ne, %10, %c0_i32_8 : i32
    scf.if %11 {
      %c0_9 = arith.constant 0 : index
      %c0_10 = arith.constant 0 : index
      %12 = vector.load %arg6[%c0_9, %c0_10] : memref<8x256xf32, #tpu.memory_space<vmem>>, vector<8x256xf32>
      %c0_11 = arith.constant 0 : index
      %c0_12 = arith.constant 0 : index
      %13 = vector.load %arg4[%c0_11, %c0_12] : memref<1x256xf32, #tpu.memory_space<vmem>>, vector<1x256xf32>
      %14 = vector.broadcast %13 : vector<1x256xf32> to vector<8x256xf32>
      %15 = arith.addf %12, %14 : vector<8x256xf32>
      %cst_13 = arith.constant 0.000000e+00 : f32
      %16 = vector.broadcast %cst_13 : f32 to vector<8x256xf32>
      %17 = arith.maximumf %15, %16 : vector<8x256xf32>
      %c0_14 = arith.constant 0 : index
      %c0_15 = arith.constant 0 : index
      %18 = vector.load %arg5[%c0_14, %c0_15] : memref<8x256xf32, #tpu.memory_space<vmem>>, vector<8x256xf32>
      tpu.vector_store %arg5[%c0_14, %c0_15], %17 {strides = array<i32>} : memref<8x256xf32, #tpu.memory_space<vmem>>, vector<8x256xf32>,
    } else {
    }
    return
  }
  func.func @transform_0(%arg0: i32, %arg1: i32) -> (i32, i32) {
    %c0_i32 = arith.constant 0 : i32
    return %arg0, %arg1 : i32, i32
  }
  func.func @transform_1(%arg0: i32, %arg1: i32) -> (i32, i32) {
    %c0_i32 = arith.constant 0 : i32
    %c0_i32_0 = arith.constant 0 : i32
    return %arg1, %c0_i32 : i32, i32
  }
  func.func @transform_2(%arg0: i32, %arg1: i32) -> (i32, i32) {
    %c0_i32 = arith.constant 0 : i32
    %c0_i32_0 = arith.constant 0 : i32
    %c0_i32_1 = arith.constant 0 : i32
    return %c0_i32, %c0_i32_0 : i32, i32
  }
  func.func @transform_3(%arg0: i32, %arg1: i32) -> (i32, i32) {
    %c0_i32 = arith.constant 0 : i32
    %c0_i32_0 = arith.constant 0 : i32
    return %arg0, %c0_i32 : i32, i32
  }
}

module attributes {stable_mosaic.version = 11 : i64} {
  func.func @_mm_bias_act_kernel(%arg0: i32, %arg1: i32, %arg2: memref<128x384xbf16, #tpu.memory_space<vmem>>, %arg3: memref<384x128xbf16, #tpu.memory_space<vmem>>, %arg4: memref<1x128xf32, #tpu.memory_space<vmem>>, %arg5: memref<128x128xf32, #tpu.memory_space<vmem>>, %arg6: memref<128x128xf32, #tpu.memory_space<vmem>>) attributes {dimension_semantics = [#tpu.dimension_semantics<parallel>, #tpu.dimension_semantics<arbitrary>], iteration_bounds = array<i64: 1, 1>, scalar_prefetch = 0 : i64, scratch_operands = 1 : i64, tpu.core_type = #tpu.core_type<tc>, window_params = [{transform_indices = @transform_0, window_bounds = array<i64: 128, 384>}, {transform_indices = @transform_1, window_bounds = array<i64: 384, 128>}, {pipeline_mode = #tpu.pipeline_mode<synchronous>, transform_indices = @transform_2, window_bounds = array<i64: 1, 128>}, {transform_indices = @transform_3, window_bounds = array<i64: 128, 128>}]} {
    %c0_i32 = arith.constant 0 : i32
    %0 = arith.cmpi eq, %arg1, %c0_i32 : i32
    %1 = arith.extui %0 : i1 to i32
    %c0_i32_0 = arith.constant 0 : i32
    %2 = arith.cmpi ne, %1, %c0_i32_0 : i32
    scf.if %2 {
      %cst_10 = arith.constant 0.000000e+00 : f32
      %12 = vector.broadcast %cst_10 : f32 to vector<128x128xf32>
      %c0_11 = arith.constant 0 : index
      %c0_12 = arith.constant 0 : index
      %13 = vector.load %arg6[%c0_11, %c0_12] : memref<128x128xf32, #tpu.memory_space<vmem>>, vector<128x128xf32>
      tpu.vector_store %arg6[%c0_11, %c0_12], %12 {strides = array<i32>} : memref<128x128xf32, #tpu.memory_space<vmem>>, vector<128x128xf32>,
    } else {
    }
    %c0 = arith.constant 0 : index
    %c0_1 = arith.constant 0 : index
    %3 = vector.load %arg6[%c0, %c0_1] : memref<128x128xf32, #tpu.memory_space<vmem>>, vector<128x128xf32>
    %c0_2 = arith.constant 0 : index
    %c0_3 = arith.constant 0 : index
    %4 = vector.load %arg2[%c0_2, %c0_3] : memref<128x384xbf16, #tpu.memory_space<vmem>>, vector<128x384xbf16>
    %c0_4 = arith.constant 0 : index
    %c0_5 = arith.constant 0 : index
    %5 = vector.load %arg3[%c0_4, %c0_5] : memref<384x128xbf16, #tpu.memory_space<vmem>>, vector<384x128xbf16>
    %cst = arith.constant dense<0.000000e+00> : vector<128x128xf32>
    %6 = tpu.matmul %4, %5, %cst {dimension_numbers = #tpu.dot_dimension_numbers<[1], [0], [0], [1], [0, 0, 1, 1], [], []>} : vector<128x384xbf16>, vector<384x128xbf16>, vector<128x128xf32> -> vector<128x128xf32>
    %7 = arith.addf %3, %6 : vector<128x128xf32>
    %c0_6 = arith.constant 0 : index
    %c0_7 = arith.constant 0 : index
    %8 = vector.load %arg6[%c0_6, %c0_7] : memref<128x128xf32, #tpu.memory_space<vmem>>, vector<128x128xf32>
    tpu.vector_store %arg6[%c0_6, %c0_7], %7 {strides = array<i32>} : memref<128x128xf32, #tpu.memory_space<vmem>>, vector<128x128xf32>,
    %c0_i32_8 = arith.constant 0 : i32
    %9 = arith.cmpi eq, %arg1, %c0_i32_8 : i32
    %10 = arith.extui %9 : i1 to i32
    %c0_i32_9 = arith.constant 0 : i32
    %11 = arith.cmpi ne, %10, %c0_i32_9 : i32
    scf.if %11 {
      %c0_10 = arith.constant 0 : index
      %c0_11 = arith.constant 0 : index
      %12 = vector.load %arg6[%c0_10, %c0_11] : memref<128x128xf32, #tpu.memory_space<vmem>>, vector<128x128xf32>
      %c0_12 = arith.constant 0 : index
      %c0_13 = arith.constant 0 : index
      %13 = vector.load %arg4[%c0_12, %c0_13] : memref<1x128xf32, #tpu.memory_space<vmem>>, vector<1x128xf32>
      %14 = vector.broadcast %13 : vector<1x128xf32> to vector<128x128xf32>
      %15 = arith.addf %12, %14 : vector<128x128xf32>
      %16 = arith.negf %15 : vector<128x128xf32>
      %17 = math.exp %16 : vector<128x128xf32>
      %cst_14 = arith.constant 1.000000e+00 : f32
      %18 = vector.broadcast %cst_14 : f32 to vector<128x128xf32>
      %19 = arith.addf %18, %17 : vector<128x128xf32>
      %20 = arith.divf %18, %19 : vector<128x128xf32>
      %c0_15 = arith.constant 0 : index
      %c0_16 = arith.constant 0 : index
      %21 = vector.load %arg5[%c0_15, %c0_16] : memref<128x128xf32, #tpu.memory_space<vmem>>, vector<128x128xf32>
      tpu.vector_store %arg5[%c0_15, %c0_16], %20 {strides = array<i32>} : memref<128x128xf32, #tpu.memory_space<vmem>>, vector<128x128xf32>,
    } else {
    }
    return
  }
  func.func @transform_0(%arg0: i32, %arg1: i32) -> (i32, i32) {
    %c0_i32 = arith.constant 0 : i32
    return %arg0, %arg1 : i32, i32
  }
  func.func @transform_1(%arg0: i32, %arg1: i32) -> (i32, i32) {
    %c0_i32 = arith.constant 0 : i32
    %c0_i32_0 = arith.constant 0 : i32
    return %arg1, %c0_i32 : i32, i32
  }
  func.func @transform_2(%arg0: i32, %arg1: i32) -> (i32, i32) {
    %c0_i32 = arith.constant 0 : i32
    %c0_i32_0 = arith.constant 0 : i32
    %c0_i32_1 = arith.constant 0 : i32
    return %c0_i32, %c0_i32_0 : i32, i32
  }
  func.func @transform_3(%arg0: i32, %arg1: i32) -> (i32, i32) {
    %c0_i32 = arith.constant 0 : i32
    %c0_i32_0 = arith.constant 0 : i32
    return %arg0, %c0_i32 : i32, i32
  }
}

</mosaic_0001>

<bundles_post_ra>
// kernel: simple_depth_cnn_forward.6
= control target key start
LH: loop header
LB: loop body
LE: loop exit
PB: predicated region body
PF: predicated region fallthrough
CT: control target
= control target key end

     0   :  { %s602_s1 = inlined_call_operand.vmem [shape: bf16[128,128], index: 1, kind: input, shape index: {}]   ;;  %s603_s0 = inlined_call_operand.vmem [shape: bf16[128,128], index: 0, kind: input, shape index: {}]   ;;  %s604_s2 = inlined_call_operand.vmem [shape: f32[1,128], index: 2, kind: input, shape index: {}]   ;;  %s605_s3 = inlined_call_operand.vmem [shape: f32[128,128], index: 3, kind: output, shape index: {}]  }
   0x1   :  { %v467_v0 = vld [vmem:[%s602_s1] sm:$0xff]   ;;  %v468_v1 = vld [vmem:[%s602_s1 + $0x8] sm:$0xff]   ;;  %v469_v2 = vld [vmem:[%s602_s1 + $0x10] sm:$0xff]  }
   0x2   :  { %419 = vmatprep.subr.bf16.mxu0 %v467_v0  ;;  %451 = vmatprep.subr.bf16.mxu1 %v467_v0  ;;  %v470_v3 = vld [vmem:[%s602_s1 + $0x18] sm:$0xff]   ;;  %v475_v4 = vld [vmem:[%s603_s0] sm:$0xff]   ;;  %v472_v7 = vld [vmem:[%s602_s1 + $0x28] sm:$0xff]  }
   0x3   :  { %420 = vmatpush3.bf16.msra.mxu0 %v467_v0  ;;  %459 = vmatpush3.bf16.msra.mxu1 %v467_v0  ;;  %v476_v5 = vld [vmem:[%s603_s0 + $0x20] sm:$0xff]   ;;  %v473_v8 = vld [vmem:[%s602_s1 + $0x30] sm:$0xff]   ;;  %v474_v9 = vld [vmem:[%s602_s1 + $0x38] sm:$0xff]  }
   0x4   :  { %421 = vmatprep.subr.bf16.mxu0 %v468_v1  ;;  %452 = vmatprep.subr.bf16.mxu1 %v468_v1  ;;  %v471_v6 = vld [vmem:[%s602_s1 + $0x20] sm:$0xff]   ;;  %v477_v10 = vld [vmem:[%s603_s0 + $0x8] sm:$0xff]   ;;  %v479_v12 = vld [vmem:[%s603_s0 + $0x10] sm:$0xff]  }
   0x5   :  { %435 = vmatprep.mubr.bf16.mxu0 %v475_v4  ;;  %443 = vmatprep.mubr.bf16.mxu1 %v476_v5  ;;  %v478_v11 = vld [vmem:[%s603_s0 + $0x28] sm:$0xff]   ;;  %v480_v13 = vld [vmem:[%s603_s0 + $0x30] sm:$0xff]   ;;  %v481_v14 = vld [vmem:[%s603_s0 + $0x18] sm:$0xff]  }
   0x6   :  { %v482_v15 = vld [vmem:[%s603_s0 + $0x38] sm:$0xff]   ;;  %v402_v16 = vld [vmem:[%s604_s2] ss:$0 sm:$0xff] }
   0x7   :  { %422 = vmatpush3.bf16.msra.mxu0 %v468_v1  ;;  %460 = vmatpush3.bf16.msra.mxu1 %v468_v1 }
   0x8   :  { %423 = vmatprep.subr.bf16.mxu0 %v469_v2  ;;  %453 = vmatprep.subr.bf16.mxu1 %v469_v2 }
   0xb   :  { %424 = vmatpush3.bf16.msra.mxu0 %v469_v2  ;;  %461 = vmatpush3.bf16.msra.mxu1 %v469_v2 }
   0xc   :  { %425 = vmatprep.subr.bf16.mxu0 %v470_v3  ;;  %454 = vmatprep.subr.bf16.mxu1 %v470_v3 }
   0xf   :  { %426 = vmatpush3.bf16.msra.mxu0 %v470_v3  ;;  %462 = vmatpush3.bf16.msra.mxu1 %v470_v3 }
  0x10   :  { %427 = vmatprep.subr.bf16.mxu0 %v471_v6  ;;  %455 = vmatprep.subr.bf16.mxu1 %v471_v6 }
  0x13   :  { %428 = vmatpush3.bf16.msra.mxu0 %v471_v6  ;;  %463 = vmatpush3.bf16.msra.mxu1 %v471_v6 }
  0x14   :  { %429 = vmatprep.subr.bf16.mxu0 %v472_v7  ;;  %456 = vmatprep.subr.bf16.mxu1 %v472_v7 }
  0x17   :  { %430 = vmatpush3.bf16.msra.mxu0 %v472_v7  ;;  %464 = vmatpush3.bf16.msra.mxu1 %v472_v7 }
  0x18   :  { %431 = vmatprep.subr.bf16.mxu0 %v473_v8  ;;  %457 = vmatprep.subr.bf16.mxu1 %v473_v8 }
  0x1b   :  { %432 = vmatpush3.bf16.msra.mxu0 %v473_v8  ;;  %465 = vmatpush3.bf16.msra.mxu1 %v473_v8 }
  0x1c   :  { %433 = vmatprep.subr.bf16.mxu0 %v474_v9  ;;  %458 = vmatprep.subr.bf16.mxu1 %v474_v9 }
  0x1f   :  { %434 = vmatpush3.bf16.msra.mxu0 %v474_v9  ;;  %466 = vmatpush3.bf16.msra.mxu1 %v474_v9 }
  0x22   :  { %436 = vmatmul.mubr.bf16.vlgmr.msra.gmra.mrb[0].mxu0 %v477_v10  ;;  %444 = vmatmul.mubr.bf16.vlgmr.msra.gmra.mrb[0].mxu1 %v478_v11 }
  0x23   :  { %439 = vmatprep.mubr.bf16.mxu0 %v479_v12  ;;  %447 = vmatprep.mubr.bf16.mxu1 %v480_v13 }
  0x2a   :  { %440 = vmatmul.mubr.bf16.gmra.mrb[4].mxu0 %v481_v14  ;;  %448 = vmatmul.mubr.bf16.gmra.mrb[4].mxu1 %v482_v15 }
  0xf5   :  { %v437_v17 = vpop.f32.mrb[0].mxu0  ;;  %v445_v18 = vpop.f32.mrb[0].mxu1 }
  0xf6   :  { %v336_v19 = vadd.f32 %v437_v17, %v402_v16  ;;  %v344_v20 = vadd.f32 %v445_v18, %v402_v16  ;;  %v213_v21 = vpop.f32.mrb[1].mxu0  ;;  %v245_v22 = vpop.f32.mrb[1].mxu1 }
  0xf7   :  { %v334_v23 = vadd.f32 %v402_v16, %v213_v21  ;;  %v342_v24 = vadd.f32 %v402_v16, %v245_v22  ;;  %v438_v25 = vpop.f32.mrb[2].mxu0  ;;  %v446_v26 = vpop.f32.mrb[2].mxu1 }
  0xf8   :  { %v352_v27 = vmax.f32 %v336_v19, 0.0  ;;  %v360_v28 = vmax.f32 %v344_v20, 0.0  ;;  %v337_v29 = vadd.f32 %v438_v25, %v402_v16  ;;  %v345_v30 = vadd.f32 %v446_v26, %v402_v16  ;;  %v216_v31 = vpop.f32.mrb[3].mxu0  ;;  %v248_v32 = vpop.f32.mrb[3].mxu1 }
  0xf9   :  { %v350_v33 = vmax.f32 %v334_v23, 0.0  ;;  %v358_v34 = vmax.f32 %v342_v24, 0.0  ;;  %v335_v35 = vadd.f32 %v402_v16, %v216_v31  ;;  %v343_v36 = vadd.f32 %v402_v16, %v248_v32 }
  0xfa   :  { %368 = vst [vmem:[%s605_s3 + $0x10] sm:$0xff] %v352_v27  ;;  %376 = vst [vmem:[%s605_s3 + $0x50] sm:$0xff] %v360_v28  ;;  %v353_v37 = vmax.f32 %v337_v29, 0.0  ;;  %v361_v38 = vmax.f32 %v345_v30, 0.0 }
  0xfb   :  { %366 = vst [vmem:[%s605_s3] sm:$0xff] %v350_v33  ;;  %374 = vst [vmem:[%s605_s3 + $0x40] sm:$0xff] %v358_v34  ;;  %v351_v39 = vmax.f32 %v335_v35, 0.0  ;;  %v359_v40 = vmax.f32 %v343_v36, 0.0 }
  0xfc   :  { %369 = vst [vmem:[%s605_s3 + $0x18] sm:$0xff] %v353_v37  ;;  %377 = vst [vmem:[%s605_s3 + $0x58] sm:$0xff] %v361_v38 }
  0xfd   :  { %367 = vst [vmem:[%s605_s3 + $0x8] sm:$0xff] %v351_v39  ;;  %375 = vst [vmem:[%s605_s3 + $0x48] sm:$0xff] %v359_v40  ;;  %v441_v41 = vpop.f32.mrb[4].mxu0  ;;  %v449_v42 = vpop.f32.mrb[4].mxu1 }
  0xfe   :  { %v340_v43 = vadd.f32 %v441_v41, %v402_v16  ;;  %v348_v44 = vadd.f32 %v449_v42, %v402_v16  ;;  %v229_v45 = vpop.f32.mrb[5].mxu0  ;;  %v261_v46 = vpop.f32.mrb[5].mxu1 }
  0xff   :  { %v338_v47 = vadd.f32 %v402_v16, %v229_v45  ;;  %v346_v48 = vadd.f32 %v402_v16, %v261_v46  ;;  %v442_v49 = vpop.f32.mrb[6].mxu0  ;;  %v450_v50 = vpop.f32.mrb[6].mxu1 }
 0x100   :  { %v356_v51 = vmax.f32 %v340_v43, 0.0  ;;  %v364_v52 = vmax.f32 %v348_v44, 0.0  ;;  %v341_v53 = vadd.f32 %v442_v49, %v402_v16  ;;  %v349_v54 = vadd.f32 %v450_v50, %v402_v16  ;;  %v232_v55 = vpop.f32.mrb[7].mxu0  ;;  %v264_v56 = vpop.f32.mrb[7].mxu1 }
 0x101   :  { %v354_v57 = vmax.f32 %v338_v47, 0.0  ;;  %v362_v58 = vmax.f32 %v346_v48, 0.0  ;;  %v339_v59 = vadd.f32 %v402_v16, %v232_v55  ;;  %v347_v60 = vadd.f32 %v402_v16, %v264_v56 }
 0x102   :  { %372 = vst [vmem:[%s605_s3 + $0x30] sm:$0xff] %v356_v51  ;;  %380 = vst [vmem:[%s605_s3 + $0x70] sm:$0xff] %v364_v52  ;;  %v357_v61 = vmax.f32 %v341_v53, 0.0  ;;  %v365_v62 = vmax.f32 %v349_v54, 0.0 }
 0x103   :  { %370 = vst [vmem:[%s605_s3 + $0x20] sm:$0xff] %v354_v57  ;;  %378 = vst [vmem:[%s605_s3 + $0x60] sm:$0xff] %v362_v58  ;;  %v355_v63 = vmax.f32 %v339_v59, 0.0  ;;  %v363_v0 = vmax.f32 %v347_v60, 0.0 }
 0x104   :  { %373 = vst [vmem:[%s605_s3 + $0x38] sm:$0xff] %v357_v61  ;;  %381 = vst [vmem:[%s605_s3 + $0x78] sm:$0xff] %v365_v62 }
 0x105   :  { %371 = vst [vmem:[%s605_s3 + $0x28] sm:$0xff] %v355_v63  ;;  %379 = vst [vmem:[%s605_s3 + $0x68] sm:$0xff] %v363_v0 }

// kernel: simple_depth_cnn_forward.7
= control target key start
LH: loop header
LB: loop body
LE: loop exit
PB: predicated region body
PF: predicated region fallthrough
CT: control target
= control target key end

     0   :  { %s1040_s12 = smov 0   ;;  %s1042_s13 = smov 0   ;;  %s1166_s0 = inlined_call_operand.vmem [shape: bf16[32,1024], index: 0, kind: input, shape index: {}]   ;;  %s1167_s1 = inlined_call_operand.vmem [shape: bf16[1024,128], index: 1, kind: input, shape index: {}]   ;;  %s1168_s2 = inlined_call_operand.vmem [shape: f32[1,128], index: 2, kind: input, shape index: {}]   ;;  %s1169_s3 = inlined_call_operand.vmem [shape: f32[32,128], index: 3, kind: output, shape index: {}]  }
   0x1   :  { %s1044_s14 = smov 0   ;;  %s1046_s15 = smov 0  }
   0x2   :  { %s1048_s16 = smov 0  }
   0x3 LB: > { %s22_s17 = sadd.s32 1, %s1013_s15  ;;  %p41_p1 = scmp.ne.s32.totalorder %s1005_s13, %s1001_s12  ;;  %s1017_s16 = sphi %s1048_s16, %s13_s16   ;;  %s1013_s15 = sphi %s1046_s15, %s1173_s15   ;;  %s1009_s14 = sphi %s1044_s14, %s1172_s14   ;;  %s1005_s13 = sphi %s1042_s13, %s1171_s13   ;;  %s1001_s12 = sphi %s1040_s12, %s1170_s12  }
   0x4   : > { %p23_p0 = scmp.ge.s32.totalorder %s22_s17, 2  ;;  %p42_p2 = scmp.eq.s32.totalorder %s1017_s16, 0 }
   0x5   : > { %s34_s19 = sadd.s32 1, %s1005_s13  ;;  %p782_p5 = scmp.ge.s32.totalorder %s1017_s16, 2 }
   0x6   : > { %s1175_s17 = smov (%p23_p0, %s22_s17), 0  ;;  %p43_p3 = por %p42_p2, %p41_p1 }
   0x7   : > { %s30_s18 = ssub.s32 %s1013_s15, %s1175_s17  ;;  %143 = sbr.rel (%p782_p5) target bundleno = 22 (0x16), region = 20 }
   0x8   : > { %p32_p4 = scmp.eq.s32.totalorder %s30_s18, 0 }
   0xa   : > { %s1075_s20 = scalar_select %p32_p4, %s1005_s13, %s34_s19  }
   0xe   : > { %146 = sbr.rel (!%p43_p3) target bundleno = 22 (0x16), region = 24  ;;  %s148_s21 = sand.u32 (%p43_p3), 1, %s1005_s13  }
   0xf   : > { %s837_s22 = sshll.u32 (%p43_p3), %s1013_s15, 4  ;;  %s783_s23 = sshll.u32 (%p43_p3), %s148_s21, 6 }
  0x10   : > { %s156_s26 = scalar_lea.vmem (%p43_p3), %s1166_s0, %s837_s22  ;;  %s150_s27 = scalar_lea.vmem (%p43_p3), [#allocation3], %s783_s23 }
  0x11   : > { %v169_v0 = vld [vmem:[%s156_s26] sm:$0xff] (%p43_p3)  ;;  %v171_v1 = vld [vmem:[%s156_s26 + $0x8] sm:$0xff] (%p43_p3) }
  0x12   : > { %v173_v2 = vld [vmem:[%s156_s26 + $0x20] sm:$0xff] (%p43_p3)  ;;  %170 = vst [vmem:[%s150_s27] sm:$0xff] (%p43_p3), %v169_v0  ;;  %172 = vst [vmem:[%s150_s27 + $0x8] sm:$0xff] (%p43_p3), %v171_v1  ;;  %v175_v3 = vld [vmem:[%s156_s26 + $0x28] sm:$0xff] (%p43_p3) }
  0x13   : > { %174 = vst [vmem:[%s150_s27 + $0x10] sm:$0xff] (%p43_p3), %v173_v2  ;;  %v177_v4 = vld [vmem:[%s156_s26 + $0x40] sm:$0xff] (%p43_p3)  ;;  %v179_v5 = vld [vmem:[%s156_s26 + $0x48] sm:$0xff] (%p43_p3)  ;;  %176 = vst [vmem:[%s150_s27 + $0x18] sm:$0xff] (%p43_p3), %v175_v3 }
  0x14   : > { %178 = vst [vmem:[%s150_s27 + $0x20] sm:$0xff] (%p43_p3), %v177_v4  ;;  %180 = vst [vmem:[%s150_s27 + $0x28] sm:$0xff] (%p43_p3), %v179_v5  ;;  %v181_v6 = vld [vmem:[%s156_s26 + $0x60] sm:$0xff] (%p43_p3)  ;;  %v183_v7 = vld [vmem:[%s156_s26 + $0x68] sm:$0xff] (%p43_p3) }
  0x15   : > { %182 = vst [vmem:[%s150_s27 + $0x30] sm:$0xff] %v181_v6  ;;  %184 = vst [vmem:[%s150_s27 + $0x38] sm:$0xff] %v183_v7 }
  0x16 PF: > { %p786_p6 = scmp.ge.s32.totalorder %s1017_s16, 1  ;;  %p198_p7 = scmp.lt.s32.totalorder %s1017_s16, 3 }
  0x18   : > { %p199_p8 = pnand %p786_p6, %p198_p7 }
  0x19   : > { %s205_s28 = sand.u32 (!%p199_p8), 1, %s1001_s12   ;;  %s788_s29 = sshll.u32 (!%p199_p8), %s1009_s14, 6 }
  0x1a   : > { %202 = sbr.rel (%p199_p8) target bundleno = 317 (0x13d), region = 51  ;;  %s787_s30 = sshll.u32 (!%p199_p8), %s205_s28, 6 }
  0x1b   : > { %p236_p9 = scmp.lt.s32.totalorder (!%p199_p8), %s788_s29, 127  ;;  %s1092_s8 = scalar_lea.vmem (!%p199_p8), [#allocation3], %s787_s30 }
  0x1c   : > { %p790_p10 = scmp.ne.s32.totalorder (!%p199_p8), %s1009_s14, 0 }
  0x21   : > { %s1177_s29 = smov (!%p236_p9, %s788_s29), 127  ;;  %251 = sbr.rel (%p790_p10) target bundleno = 40 (0x28), region = 59 }
  0x22   : > { %s789_s4 = sshll.u32 %s1177_s29, 2  ;;  %v1019_v8 = vmov (!%p790_p10), 0.0  }
  0x23   : > { %s1090_s7 = scalar_lea.vmem %s1167_s1, %s789_s4  ;;  %252 = vst [vmem:[#allocation2] sm:$0xff] (!%p790_p10), %v1019_v8  ;;  %253 = vst [vmem:[#allocation2 + $0x8] sm:$0xff] (!%p790_p10), %v1019_v8 }
  0x24   : > { %254 = vst [vmem:[#allocation2 + $0x10] sm:$0xff] (!%p790_p10), %v1019_v8  ;;  %255 = vst [vmem:[#allocation2 + $0x18] sm:$0xff] (!%p790_p10), %v1019_v8 }
  0x28 PF: > { %v935_v9 = vld [vmem:[%s1090_s7 + $0x40] sm:$0xff]   ;;  %v939_v13 = vld [vmem:[%s1090_s7 + $0x48] sm:$0xff]   ;;  %v943_v17 = vld [vmem:[%s1090_s7 + $0x50] sm:$0xff]   ;;  %p831_p11 = scmp.ne.s32.totalorder %s1009_s14, 1 }
  0x29   : > { %v936_v10 = vld [vmem:[%s1090_s7 + $0xc0] sm:$0xff]   ;;  %838 = vmatprep.subr.bf16.mxu0 %v935_v9  ;;  %v940_v14 = vld [vmem:[%s1090_s7 + $0xc8] sm:$0xff]   ;;  %v944_v18 = vld [vmem:[%s1090_s7 + $0xd0] sm:$0xff]  }
  0x2a   : > { %v937_v11 = vld [vmem:[%s1090_s7] sm:$0xff]   ;;  %866 = vmatprep.subr.bf16.mxu1 %v936_v10  ;;  %v941_v15 = vld [vmem:[%s1090_s7 + $0x8] sm:$0xff]   ;;  %v945_v19 = vld [vmem:[%s1090_s7 + $0x10] sm:$0xff]  }
  0x2b   : > { %v938_v12 = vld [vmem:[%s1090_s7 + $0x80] sm:$0xff]   ;;  %839 = vmatpush3.bf16.msra.mxu0 %v937_v11  ;;  %v942_v16 = vld [vmem:[%s1090_s7 + $0x88] sm:$0xff]   ;;  %v946_v20 = vld [vmem:[%s1090_s7 + $0x90] sm:$0xff]  }
  0x2c   : > { %867 = vmatpush3.bf16.msra.mxu1 %v938_v12  ;;  %840 = vmatprep.subr.bf16.mxu0 %v939_v13  ;;  %v947_v21 = vld [vmem:[%s1090_s7 + $0x58] sm:$0xff]   ;;  %v951_v25 = vld [vmem:[%s1090_s7 + $0x60] sm:$0xff]   ;;  %v955_v29 = vld [vmem:[%s1090_s7 + $0x68] sm:$0xff]  }
  0x2d   : > { %868 = vmatprep.subr.bf16.mxu1 %v940_v14  ;;  %v948_v22 = vld [vmem:[%s1090_s7 + $0xd8] sm:$0xff]   ;;  %v952_v26 = vld [vmem:[%s1090_s7 + $0xe0] sm:$0xff]   ;;  %v956_v30 = vld [vmem:[%s1090_s7 + $0xe8] sm:$0xff]  }
  0x2e   : > { %v949_v23 = vld [vmem:[%s1090_s7 + $0x18] sm:$0xff]   ;;  %v953_v27 = vld [vmem:[%s1090_s7 + $0x20] sm:$0xff]   ;;  %v957_v31 = vld [vmem:[%s1090_s7 + $0x28] sm:$0xff]  }
  0x2f   : > { %841 = vmatpush3.bf16.msra.mxu0 %v941_v15  ;;  %v950_v24 = vld [vmem:[%s1090_s7 + $0x98] sm:$0xff]   ;;  %v954_v28 = vld [vmem:[%s1090_s7 + $0xa0] sm:$0xff]   ;;  %v958_v32 = vld [vmem:[%s1090_s7 + $0xa8] sm:$0xff]  }
  0x30   : > { %869 = vmatpush3.bf16.msra.mxu1 %v942_v16  ;;  %842 = vmatprep.subr.bf16.mxu0 %v943_v17  ;;  %v959_v33 = vld [vmem:[%s1090_s7 + $0x70] sm:$0xff]   ;;  %v963_v37 = vld [vmem:[%s1090_s7 + $0x78] sm:$0xff]   ;;  %v256_v58 = vld [vmem:[#allocation2] sm:$0xff] }
  0x31   : > { %870 = vmatprep.subr.bf16.mxu1 %v944_v18  ;;  %v960_v34 = vld [vmem:[%s1090_s7 + $0xf0] sm:$0xff]   ;;  %v964_v38 = vld [vmem:[%s1090_s7 + $0xf8] sm:$0xff]   ;;  %v257_v63 = vld [vmem:[#allocation2 + $0x8] sm:$0xff] }
  0x32   : > { %v961_v35 = vld [vmem:[%s1090_s7 + $0x30] sm:$0xff]   ;;  %v965_v39 = vld [vmem:[%s1090_s7 + $0x38] sm:$0xff]  }
  0x33   : > { %843 = vmatpush3.bf16.msra.mxu0 %v945_v19  ;;  %v962_v36 = vld [vmem:[%s1090_s7 + $0xb0] sm:$0xff]   ;;  %v966_v40 = vld [vmem:[%s1090_s7 + $0xb8] sm:$0xff]  }
  0x34   : > { %871 = vmatpush3.bf16.msra.mxu1 %v946_v20  ;;  %844 = vmatprep.subr.bf16.mxu0 %v947_v21  ;;  %v967_v41 = vld [vmem:[%s1092_s8] ss:$16 sps:$4 sm:$0xff]   ;;  %v969_v42 = vld [vmem:[%s1092_s8 + $0x4] ss:$16 sps:$4 sm:$0xff]   ;;  %v970_v43 = vld [vmem:[%s1092_s8 + $0x8] ss:$16 sps:$4 sm:$0xff]  }
  0x35   : > { %872 = vmatprep.subr.bf16.mxu1 %v948_v22  ;;  %v972_v44 = vld [vmem:[%s1092_s8 + $0xc] ss:$16 sps:$4 sm:$0xff]   ;;  %596 = vmatprep.mubr.bf16.mxu0 %v969_v42  ;;  %v973_v45 = vld [vmem:[%s1092_s8 + $0x24] ss:$16 sps:$4 sm:$0xff]   ;;  %v977_v47 = vld [vmem:[%s1092_s8 + $0x20] ss:$16 sps:$4 sm:$0xff]  }
  0x36   : > { %645 = vmatprep.mubr.bf16.mxu1 %v972_v44  ;;  %v975_v46 = vld [vmem:[%s1092_s8 + $0x2c] ss:$16 sps:$4 sm:$0xff]   ;;  %v978_v48 = vld [vmem:[%s1092_s8 + $0x28] ss:$16 sps:$4 sm:$0xff]   ;;  %v258_v12 = vld [vmem:[#allocation2 + $0x10] sm:$0xff] }
  0x37   : > { %845 = vmatpush3.bf16.msra.mxu0 %v949_v23  ;;  %v259_v17 = vld [vmem:[#allocation2 + $0x18] sm:$0xff]  ;;  %v832_v22 = vld [vmem:[%s1168_s2] ss:$0 sm:$0xff] (!%p831_p11) }
  0x38   : > { %873 = vmatpush3.bf16.msra.mxu1 %v950_v24  ;;  %846 = vmatprep.subr.bf16.mxu0 %v951_v25 }
  0x39   : > { %874 = vmatprep.subr.bf16.mxu1 %v952_v26 }
  0x3b   : > { %847 = vmatpush3.bf16.msra.mxu0 %v953_v27 }
  0x3c   : > { %875 = vmatpush3.bf16.msra.mxu1 %v954_v28  ;;  %848 = vmatprep.subr.bf16.mxu0 %v955_v29 }
  0x3d   : > { %876 = vmatprep.subr.bf16.mxu1 %v956_v30 }
  0x3f   : > { %849 = vmatpush3.bf16.msra.mxu0 %v957_v31 }
  0x40   : > { %877 = vmatpush3.bf16.msra.mxu1 %v958_v32  ;;  %850 = vmatprep.subr.bf16.mxu0 %v959_v33 }
  0x41   : > { %878 = vmatprep.subr.bf16.mxu1 %v960_v34 }
  0x43   : > { %851 = vmatpush3.bf16.msra.mxu0 %v961_v35 }
  0x44   : > { %879 = vmatpush3.bf16.msra.mxu1 %v962_v36  ;;  %852 = vmatprep.subr.bf16.mxu0 %v963_v37 }
  0x45   : > { %880 = vmatprep.subr.bf16.mxu1 %v964_v38 }
  0x47   : > { %853 = vmatpush3.bf16.msra.mxu0 %v965_v39 }
  0x48   : > { %881 = vmatpush3.bf16.msra.mxu1 %v966_v40 }
  0x4a   : > { %597 = vmatmul.mubr.bf16.vlgmr.msra.gmra.mrb[0].mxu0 %v967_v41 }
  0x4b   : > { %646 = vmatmul.mubr.bf16.vlgmr.msra.gmra.mrb[0].mxu1 %v970_v43  ;;  %604 = vmatprep.mubr.bf16.mxu0 %v973_v45 }
  0x4c   : > { %653 = vmatprep.mubr.bf16.mxu1 %v975_v46 }
  0x52   : > { %605 = vmatmul.mubr.bf16.gmra.mrb[4].mxu0 %v977_v47 }
  0x53   : > { %654 = vmatmul.mubr.bf16.gmra.mrb[4].mxu1 %v978_v48 }
 0x11d   : > { %v854_v49 = vpop.f32.mrb[0].mxu0 }
 0x11e   : > { %v882_v50 = vpop.f32.mrb[0].mxu1  ;;  %v855_v51 = vpop.f32.mrb[1].mxu0 }
 0x11f   : > { %v856_v52 = vadd.f32 %v855_v51, %v854_v49  ;;  %v883_v53 = vpop.f32.mrb[1].mxu1  ;;  %v857_v54 = vpop.f32.mrb[2].mxu0 }
 0x120   : > { %v884_v55 = vadd.f32 %v883_v53, %v882_v50  ;;  %v885_v56 = vpop.f32.mrb[2].mxu1  ;;  %v858_v57 = vpop.f32.mrb[3].mxu0 }
 0x121   : > { %v859_v59 = vadd.f32 %v858_v57, %v857_v54  ;;  %v886_v60 = vpop.f32.mrb[3].mxu1 }
 0x122   : > { %v648_v61 = vadd.f32 %v884_v55, %v856_v52  ;;  %v887_v62 = vadd.f32 %v886_v60, %v885_v56 }
 0x124   : > { %v662_v0 = vadd.f32 %v648_v61, %v256_v58  ;;  %v651_v1 = vadd.f32 %v887_v62, %v859_v59 }
 0x125   : > { %v860_v2 = vpop.f32.mrb[4].mxu0 }
 0x126   : > { %666 = vst [vmem:[#allocation2] sm:$0xff] %v662_v0  ;;  %v663_v3 = vadd.f32 %v651_v1, %v257_v63  ;;  %v888_v4 = vpop.f32.mrb[4].mxu1  ;;  %v861_v5 = vpop.f32.mrb[5].mxu0 }
 0x127   : > { %v862_v6 = vadd.f32 %v861_v5, %v860_v2  ;;  %v889_v7 = vpop.f32.mrb[5].mxu1  ;;  %v863_v8 = vpop.f32.mrb[6].mxu0 }
 0x128   : > { %667 = vst [vmem:[#allocation2 + $0x8] sm:$0xff] %v663_v3  ;;  %v890_v9 = vadd.f32 %v889_v7, %v888_v4  ;;  %v891_v10 = vpop.f32.mrb[6].mxu1  ;;  %v864_v11 = vpop.f32.mrb[7].mxu0 }
 0x129   : > { %v865_v13 = vadd.f32 %v864_v11, %v863_v8  ;;  %v892_v14 = vpop.f32.mrb[7].mxu1 }
 0x12a   : > { %v656_v15 = vadd.f32 %v890_v9, %v862_v6  ;;  %v893_v16 = vadd.f32 %v892_v14, %v891_v10  ;;  %673 = sbr.rel (%p831_p11) target bundleno = 317 (0x13d), region = 63 }
 0x12c   : > { %v664_v18 = vadd.f32 %v656_v15, %v258_v12  ;;  %v659_v19 = vadd.f32 %v893_v16, %v865_v13 }
 0x12d   : > { %v674_v21 = vld [vmem:[#allocation2] sm:$0xff] (!%p831_p11) }
 0x12e   : > { %668 = vst [vmem:[#allocation2 + $0x10] sm:$0xff] %v664_v18  ;;  %v665_v20 = vadd.f32 %v659_v19, %v259_v17  ;;  %v685_v24 = vadd.f32 (!%p831_p11), %v832_v22, %v674_v21 }
 0x12f   : > { %v675_v23 = vld [vmem:[#allocation2 + $0x8] sm:$0xff] (!%p831_p11) }
 0x130   : > { %669 = vst [vmem:[#allocation2 + $0x18] sm:$0xff] %v665_v20  ;;  %v686_v25 = vadd.f32 (!%p831_p11), %v832_v22, %v675_v23  ;;  %v689_v30 = vmax.f32 (!%p831_p11), %v685_v24, 0.0 }
 0x132   : > { %v690_v31 = vmax.f32 %v686_v25, 0.0  ;;  %693 = vst [vmem:[%s1169_s3] sm:$0xff] %v689_v30 }
 0x134   : > { %694 = vst [vmem:[%s1169_s3 + $0x8] sm:$0xff] %v690_v31 }
 0x135   : > { %v676_v26 = vld [vmem:[#allocation2 + $0x10] sm:$0xff] }
 0x136   : > { %v687_v28 = vadd.f32 %v832_v22, %v676_v26 }
 0x137   : > { %v677_v27 = vld [vmem:[#allocation2 + $0x18] sm:$0xff] }
 0x138   : > { %v688_v29 = vadd.f32 %v832_v22, %v677_v27  ;;  %v691_v32 = vmax.f32 %v687_v28, 0.0 }
 0x13a   : > { %v692_v33 = vmax.f32 %v688_v29, 0.0  ;;  %695 = vst [vmem:[%s1169_s3 + $0x10] sm:$0xff] %v691_v32 }
 0x13c   : > { %696 = vst [vmem:[%s1169_s3 + $0x18] sm:$0xff] %v692_v33 }
 0x13d PF: > { %s13_s16 = sadd.s32 1, %s1017_s16   ;;  %s1170_s12 = smov %s1005_s13 }
 0x13e   : > { %p10_p12 = scmp.ge.s32.totalorder %s13_s16, 4   ;;  %s1171_s13 = smov %s1075_s20 }
 0x13f   : > { %s1172_s14 = smov %s1013_s15  ;;  %s1173_s15 = smov %s1175_s17 }
 0x140   :  { %12 = sbr.rel (!%p10_p12) target bundleno = 3 (0x3), region = 101 }

// kernel: simple_depth_cnn_forward.8
= control target key start
LH: loop header
LB: loop body
LE: loop exit
PB: predicated region body
PF: predicated region fallthrough
CT: control target
= control target key end

     0   :  { %s872_s12 = smov 0   ;;  %s874_s13 = smov 0   ;;  %s955_s0 = inlined_call_operand.vmem [shape: bf16[8,2048], index: 0, kind: input, shape index: {}]   ;;  %s956_s1 = inlined_call_operand.vmem [shape: bf16[2048,128], index: 1, kind: input, shape index: {}]   ;;  %s957_s2 = inlined_call_operand.vmem [shape: f32[1,128], index: 2, kind: input, shape index: {}]   ;;  %s958_s3 = inlined_call_operand.vmem [shape: f32[8,128], index: 3, kind: output, shape index: {}]  }
   0x1   :  { %s876_s14 = smov 0  }
   0x2 LB: > { %s22_s15 = sadd.s32 1, %s845_s13  ;;  %p675_p0 = scmp.ge.s32.totalorder %s849_s14, 1  ;;  %s849_s14 = sphi %s876_s14, %s13_s14   ;;  %s845_s13 = sphi %s874_s13, %s960_s13   ;;  %s841_s12 = sphi %s872_s12, %s959_s12  }
   0x3   : > { %p23_p1 = scmp.ge.s32.totalorder %s22_s15, 4  ;;  %p167_p2 = scmp.lt.s32.totalorder %s849_s14, 5 }
   0x5   : > { %s962_s15 = smov (%p23_p1, %s22_s15), 0  ;;  %p168_p3 = pnand %p675_p0, %p167_p2 }
   0x6   : > { %s676_s16 = sshll.u32 (!%p168_p3), %s841_s12, 2  ;;  %s678_s17 = sshll.u32 (!%p168_p3), %s841_s12, 6 }
   0x7   : > { %171 = sbr.rel (%p168_p3) target bundleno = 291 (0x123), region = 32  ;;  %p202_p4 = scmp.lt.s32.totalorder (!%p168_p3), %s676_s16, 15 }
   0x8   : > { %p210_p5 = scmp.lt.s32.totalorder (!%p168_p3), %s678_s17, 255  ;;  %p680_p6 = scmp.ne.s32.totalorder (!%p168_p3), %s841_s12, 0 }
   0xe   : > { %s964_s16 = smov (!%p202_p4, %s676_s16), 15  ;;  %s966_s17 = smov (!%p210_p5, %s678_s17), 255 }
   0xf   : > { %s677_s18 = sshll.u32 %s964_s16, 2  ;;  %s679_s22 = sshll.u32 %s966_s17, 2  ;;  %v851_v0 = vmov (!%p680_p6), 0.0  }
  0x10   : > { %s897_s21 = scalar_lea.vmem %s955_s0, %s677_s18  ;;  %s902_s25 = scalar_lea.vmem %s956_s1, %s679_s22  ;;  %224 = vst [vmem:[#allocation2] sm:$0xff] (!%p680_p6), %v851_v0 }
  0x11   : > { %223 = sbr.rel (%p680_p6) target bundleno = 24 (0x18), region = 36 }
  0x18 PF: > { %v791_v1 = vld [vmem:[%s902_s25 + $0x40] sm:$0xff]   ;;  %v795_v5 = vld [vmem:[%s902_s25 + $0x48] sm:$0xff]   ;;  %v799_v9 = vld [vmem:[%s902_s25 + $0x50] sm:$0xff]   ;;  %p717_p7 = scmp.ne.s32.totalorder %s841_s12, 3 }
  0x19   : > { %v792_v2 = vld [vmem:[%s902_s25 + $0xc0] sm:$0xff]   ;;  %722 = vmatprep.subr.bf16.mxu0 %v791_v1  ;;  %v796_v6 = vld [vmem:[%s902_s25 + $0xc8] sm:$0xff]   ;;  %v800_v10 = vld [vmem:[%s902_s25 + $0xd0] sm:$0xff]  }
  0x1a   : > { %v793_v3 = vld [vmem:[%s902_s25] sm:$0xff]   ;;  %744 = vmatprep.subr.bf16.mxu1 %v792_v2  ;;  %v797_v7 = vld [vmem:[%s902_s25 + $0x8] sm:$0xff]   ;;  %v801_v11 = vld [vmem:[%s902_s25 + $0x10] sm:$0xff]  }
  0x1b   : > { %v794_v4 = vld [vmem:[%s902_s25 + $0x80] sm:$0xff]   ;;  %723 = vmatpush3.bf16.msra.mxu0 %v793_v3  ;;  %v798_v8 = vld [vmem:[%s902_s25 + $0x88] sm:$0xff]   ;;  %v802_v12 = vld [vmem:[%s902_s25 + $0x90] sm:$0xff]  }
  0x1c   : > { %745 = vmatpush3.bf16.msra.mxu1 %v794_v4  ;;  %724 = vmatprep.subr.bf16.mxu0 %v795_v5  ;;  %v803_v13 = vld [vmem:[%s902_s25 + $0x58] sm:$0xff]   ;;  %v807_v17 = vld [vmem:[%s902_s25 + $0x60] sm:$0xff]   ;;  %v811_v21 = vld [vmem:[%s902_s25 + $0x68] sm:$0xff]  }
  0x1d   : > { %746 = vmatprep.subr.bf16.mxu1 %v796_v6  ;;  %v804_v14 = vld [vmem:[%s902_s25 + $0xd8] sm:$0xff]   ;;  %v808_v18 = vld [vmem:[%s902_s25 + $0xe0] sm:$0xff]   ;;  %v812_v22 = vld [vmem:[%s902_s25 + $0xe8] sm:$0xff]  }
  0x1e   : > { %v805_v15 = vld [vmem:[%s902_s25 + $0x18] sm:$0xff]   ;;  %v809_v19 = vld [vmem:[%s902_s25 + $0x20] sm:$0xff]   ;;  %v813_v23 = vld [vmem:[%s902_s25 + $0x28] sm:$0xff]  }
  0x1f   : > { %725 = vmatpush3.bf16.msra.mxu0 %v797_v7  ;;  %v806_v16 = vld [vmem:[%s902_s25 + $0x98] sm:$0xff]   ;;  %v810_v20 = vld [vmem:[%s902_s25 + $0xa0] sm:$0xff]   ;;  %v814_v24 = vld [vmem:[%s902_s25 + $0xa8] sm:$0xff]  }
  0x20   : > { %747 = vmatpush3.bf16.msra.mxu1 %v798_v8  ;;  %726 = vmatprep.subr.bf16.mxu0 %v799_v9  ;;  %v815_v25 = vld [vmem:[%s902_s25 + $0x70] sm:$0xff]   ;;  %v819_v29 = vld [vmem:[%s902_s25 + $0x78] sm:$0xff]   ;;  %v226_v33 = vld [vmem:[%s897_s21] sm:$0xff] }
  0x21   : > { %748 = vmatprep.subr.bf16.mxu1 %v800_v10  ;;  %v816_v26 = vld [vmem:[%s902_s25 + $0xf0] sm:$0xff]   ;;  %v820_v30 = vld [vmem:[%s902_s25 + $0xf8] sm:$0xff]   ;;  %v227_v34 = vld [vmem:[%s897_s21 + $0x8] sm:$0xff]  ;;  %v681_v35 = vcombine.low %v226_v33, %v226_v33  ;;  %v682_v36 = vcombine.high %v226_v33, %v226_v33 }
  0x22   : > { %v817_v27 = vld [vmem:[%s902_s25 + $0x30] sm:$0xff]   ;;  %v821_v31 = vld [vmem:[%s902_s25 + $0x38] sm:$0xff]   ;;  %v683_v37 = vcombine.low %v227_v34, %v227_v34  ;;  %v684_v38 = vcombine.high %v227_v34, %v227_v34  ;;  %v225_v47 = vld [vmem:[#allocation2] sm:$0xff] }
  0x23   : > { %727 = vmatpush3.bf16.msra.mxu0 %v801_v11  ;;  %v818_v28 = vld [vmem:[%s902_s25 + $0xb0] sm:$0xff]   ;;  %v822_v32 = vld [vmem:[%s902_s25 + $0xb8] sm:$0xff]   ;;  %530 = vmatprep.mubr.bf16.mxu0 %v682_v36  ;;  %v718_v53 = vld [vmem:[%s957_s2] ss:$0 sm:$0xff] (!%p717_p7) }
  0x24   : > { %749 = vmatpush3.bf16.msra.mxu1 %v802_v12  ;;  %728 = vmatprep.subr.bf16.mxu0 %v803_v13 }
  0x25   : > { %750 = vmatprep.subr.bf16.mxu1 %v804_v14  ;;  %570 = vmatprep.mubr.bf16.mxu1 %v684_v38 }
  0x27   : > { %729 = vmatpush3.bf16.msra.mxu0 %v805_v15 }
  0x28   : > { %751 = vmatpush3.bf16.msra.mxu1 %v806_v16  ;;  %730 = vmatprep.subr.bf16.mxu0 %v807_v17 }
  0x29   : > { %752 = vmatprep.subr.bf16.mxu1 %v808_v18 }
  0x2b   : > { %731 = vmatpush3.bf16.msra.mxu0 %v809_v19 }
  0x2c   : > { %753 = vmatpush3.bf16.msra.mxu1 %v810_v20  ;;  %732 = vmatprep.subr.bf16.mxu0 %v811_v21 }
  0x2d   : > { %754 = vmatprep.subr.bf16.mxu1 %v812_v22 }
  0x2f   : > { %733 = vmatpush3.bf16.msra.mxu0 %v813_v23 }
  0x30   : > { %755 = vmatpush3.bf16.msra.mxu1 %v814_v24  ;;  %734 = vmatprep.subr.bf16.mxu0 %v815_v25 }
  0x31   : > { %756 = vmatprep.subr.bf16.mxu1 %v816_v26 }
  0x33   : > { %735 = vmatpush3.bf16.msra.mxu0 %v817_v27 }
  0x34   : > { %757 = vmatpush3.bf16.msra.mxu1 %v818_v28  ;;  %736 = vmatprep.subr.bf16.mxu0 %v819_v29 }
  0x35   : > { %758 = vmatprep.subr.bf16.mxu1 %v820_v30 }
  0x37   : > { %737 = vmatpush3.bf16.msra.mxu0 %v821_v31 }
  0x38   : > { %759 = vmatpush3.bf16.msra.mxu1 %v822_v32 }
  0x3a   : > { %531 = vmatmul.mubr.bf16.vlgmr.msra.gmra.mrb[0].mxu0 %v681_v35 }
  0x3b   : > { %571 = vmatmul.mubr.bf16.vlgmr.msra.gmra.mrb[0].mxu1 %v683_v37 }
 0x10d   : > { %v738_v39 = vpop.f32.mrb[0].mxu0 }
 0x10e   : > { %v760_v40 = vpop.f32.mrb[0].mxu1  ;;  %v739_v41 = vpop.f32.mrb[1].mxu0 }
 0x10f   : > { %v761_v42 = vpop.f32.mrb[1].mxu1  ;;  %v740_v43 = vadd.f32 %v739_v41, %v738_v39  ;;  %v741_v45 = vpop.f32.mrb[2].mxu0 }
 0x110   : > { %v762_v44 = vadd.f32 %v761_v42, %v760_v40  ;;  %v763_v46 = vpop.f32.mrb[2].mxu1  ;;  %v742_v48 = vpop.f32.mrb[3].mxu0  ;;  %583 = sbr.rel (%p717_p7) target bundleno = 291 (0x123), region = 40 }
 0x111   : > { %v764_v49 = vpop.f32.mrb[3].mxu1 }
 0x112   : > { %v573_v50 = vadd.f32 %v762_v44, %v740_v43 }
 0x114   : > { %v578_v51 = vadd.f32 %v573_v50, %v225_v47 }
 0x116   : > { %579 = vst [vmem:[#allocation2] sm:$0xff] %v578_v51 }
 0x11d   : > { %v584_v52 = vld [vmem:[#allocation2] sm:$0xff] }
 0x11e   : > { %v592_v54 = vadd.f32 %v718_v53, %v584_v52 }
 0x120   : > { %v593_v55 = vmax.f32 %v592_v54, 0.0 }
 0x122   : > { %594 = vst [vmem:[%s958_s3] sm:$0xff] %v593_v55 }
 0x123 PF: > { %s13_s14 = sadd.s32 1, %s849_s14   ;;  %s959_s12 = smov %s845_s13 }
 0x124   : > { %p10_p8 = scmp.ge.s32.totalorder %s13_s14, 6   ;;  %s960_s13 = smov %s962_s15 }
 0x126   :  { %12 = sbr.rel (!%p10_p8) target bundleno = 2 (0x2), region = 73 }

// kernel: simple_depth_cnn_forward.9
= control target key start
LH: loop header
LB: loop body
LE: loop exit
PB: predicated region body
PF: predicated region fallthrough
CT: control target
= control target key end

     0   :  { %s1074_s12 = smov 0   ;;  %s1076_s13 = smov 0   ;;  %s1192_s0 = inlined_call_operand.vmem [shape: bf16[8,1536], index: 0, kind: input, shape index: {}]   ;;  %s1193_s1 = inlined_call_operand.vmem [shape: bf16[1536,256], index: 1, kind: input, shape index: {}]   ;;  %s1194_s2 = inlined_call_operand.vmem [shape: f32[1,256], index: 2, kind: input, shape index: {}]   ;;  %s1195_s3 = inlined_call_operand.vmem [shape: f32[8,256], index: 3, kind: output, shape index: {}]  }
   0x1   :  { %s1078_s14 = smov 0  }
   0x2 LB: > { %s22_s15 = sadd.s32 1, %s1047_s13  ;;  %p824_p0 = scmp.ge.s32.totalorder %s1051_s14, 1  ;;  %s1051_s14 = sphi %s1078_s14, %s13_s14   ;;  %s1047_s13 = sphi %s1076_s13, %s1197_s13   ;;  %s1043_s12 = sphi %s1074_s12, %s1196_s12  }
   0x3   : > { %p23_p1 = scmp.ge.s32.totalorder %s22_s15, 3  ;;  %p168_p2 = scmp.lt.s32.totalorder %s1051_s14, 4 }
   0x5   : > { %s1199_s15 = smov (%p23_p1, %s22_s15), 0  ;;  %p169_p3 = pnand %p824_p0, %p168_p2 }
   0x6   : > { %s825_s16 = sshll.u32 (!%p169_p3), %s1043_s12, 2  ;;  %s827_s17 = sshll.u32 (!%p169_p3), %s1043_s12, 6 }
   0x7   : > { %172 = sbr.rel (%p169_p3) target bundleno = 320 (0x140), region = 32  ;;  %p205_p4 = scmp.lt.s32.totalorder (!%p169_p3), %s825_s16, 11 }
   0x8   : > { %p213_p5 = scmp.lt.s32.totalorder (!%p169_p3), %s827_s17, 191  ;;  %p830_p6 = scmp.ne.s32.totalorder (!%p169_p3), %s1043_s12, 0 }
   0xe   : > { %s1201_s16 = smov (!%p205_p4, %s825_s16), 11  ;;  %s1203_s17 = smov (!%p213_p5, %s827_s17), 191 }
   0xf   : > { %s826_s18 = sshll.u32 %s1201_s16, 2  ;;  %s903_s22 = sshll.u32 %s1203_s17, 3  ;;  %v1053_v0 = vmov (!%p830_p6), 0.0  }
  0x10   : > { %s1099_s21 = scalar_lea.vmem %s1192_s0, %s826_s18  ;;  %s1104_s25 = scalar_lea.vmem %s1193_s1, %s903_s22  ;;  %228 = vst [vmem:[#allocation2] sm:$0xff] (!%p830_p6), %v1053_v0  ;;  %229 = vst [vmem:[#allocation2 + $0x8] sm:$0xff] (!%p830_p6), %v1053_v0 }
  0x11   : > { %227 = sbr.rel (%p830_p6) target bundleno = 24 (0x18), region = 36 }
  0x18 PF: > { %v929_v1 = vld [vmem:[%s1104_s25 + $0x4] ss:$8 sps:$4 sm:$0xff]   ;;  %v933_v3 = vld [vmem:[%s1104_s25] ss:$8 sps:$4 sm:$0xff]   ;;  %v935_v5 = vld [vmem:[%s1104_s25 + $0x14] ss:$8 sps:$4 sm:$0xff]  }
  0x19   : > { %v931_v2 = vld [vmem:[%s1104_s25 + $0x104] ss:$8 sps:$4 sm:$0xff]   ;;  %632 = vmatprep.subr.bf16.mxu0 %v929_v1  ;;  %v934_v4 = vld [vmem:[%s1104_s25 + $0x100] ss:$8 sps:$4 sm:$0xff]   ;;  %v937_v6 = vld [vmem:[%s1104_s25 + $0x114] ss:$8 sps:$4 sm:$0xff]  }
  0x1a   : > { %673 = vmatprep.subr.bf16.mxu1 %v931_v2  ;;  %633 = vmatpush1.bf16.msra.mxu0 %v933_v3  ;;  %v939_v7 = vld [vmem:[%s1104_s25 + $0x10] ss:$8 sps:$4 sm:$0xff]   ;;  %v941_v9 = vld [vmem:[%s1104_s25 + $0x24] ss:$8 sps:$4 sm:$0xff]   ;;  %v945_v11 = vld [vmem:[%s1104_s25 + $0x20] ss:$8 sps:$4 sm:$0xff]  }
  0x1b   : > { %674 = vmatpush1.bf16.msra.mxu1 %v934_v4  ;;  %634 = vmatprep.subr.bf16.mxu0 %v935_v5  ;;  %v940_v8 = vld [vmem:[%s1104_s25 + $0x110] ss:$8 sps:$4 sm:$0xff]   ;;  %v943_v10 = vld [vmem:[%s1104_s25 + $0x124] ss:$8 sps:$4 sm:$0xff]   ;;  %v946_v12 = vld [vmem:[%s1104_s25 + $0x120] ss:$8 sps:$4 sm:$0xff]  }
  0x1c   : > { %675 = vmatprep.subr.bf16.mxu1 %v937_v6  ;;  %v947_v13 = vld [vmem:[%s1104_s25 + $0x34] ss:$8 sps:$4 sm:$0xff]   ;;  %v951_v15 = vld [vmem:[%s1104_s25 + $0x30] ss:$8 sps:$4 sm:$0xff]   ;;  %v953_v17 = vld [vmem:[%s1104_s25 + $0x44] ss:$8 sps:$4 sm:$0xff]  }
  0x1d   : > { %v949_v14 = vld [vmem:[%s1104_s25 + $0x134] ss:$8 sps:$4 sm:$0xff]   ;;  %v952_v16 = vld [vmem:[%s1104_s25 + $0x130] ss:$8 sps:$4 sm:$0xff]   ;;  %v955_v18 = vld [vmem:[%s1104_s25 + $0x144] ss:$8 sps:$4 sm:$0xff]  }
  0x1e   : > { %635 = vmatpush1.bf16.msra.mxu0 %v939_v7  ;;  %v957_v19 = vld [vmem:[%s1104_s25 + $0x40] ss:$8 sps:$4 sm:$0xff]   ;;  %v959_v21 = vld [vmem:[%s1104_s25 + $0x54] ss:$8 sps:$4 sm:$0xff]   ;;  %v963_v23 = vld [vmem:[%s1104_s25 + $0x50] ss:$8 sps:$4 sm:$0xff]  }
  0x1f   : > { %676 = vmatpush1.bf16.msra.mxu1 %v940_v8  ;;  %636 = vmatprep.subr.bf16.mxu0 %v941_v9  ;;  %v958_v20 = vld [vmem:[%s1104_s25 + $0x140] ss:$8 sps:$4 sm:$0xff]   ;;  %v961_v22 = vld [vmem:[%s1104_s25 + $0x154] ss:$8 sps:$4 sm:$0xff]   ;;  %v964_v24 = vld [vmem:[%s1104_s25 + $0x150] ss:$8 sps:$4 sm:$0xff]  }
  0x20   : > { %677 = vmatprep.subr.bf16.mxu1 %v943_v10  ;;  %v965_v25 = vld [vmem:[%s1104_s25 + $0x64] ss:$8 sps:$4 sm:$0xff]   ;;  %v969_v27 = vld [vmem:[%s1104_s25 + $0x60] ss:$8 sps:$4 sm:$0xff]   ;;  %v971_v29 = vld [vmem:[%s1104_s25 + $0x74] ss:$8 sps:$4 sm:$0xff]  }
  0x21   : > { %v967_v26 = vld [vmem:[%s1104_s25 + $0x164] ss:$8 sps:$4 sm:$0xff]   ;;  %v970_v28 = vld [vmem:[%s1104_s25 + $0x160] ss:$8 sps:$4 sm:$0xff]   ;;  %v973_v30 = vld [vmem:[%s1104_s25 + $0x174] ss:$8 sps:$4 sm:$0xff]  }
  0x22   : > { %637 = vmatpush1.bf16.msra.mxu0 %v945_v11  ;;  %v975_v31 = vld [vmem:[%s1104_s25 + $0x70] ss:$8 sps:$4 sm:$0xff]   ;;  %v977_v33 = vld [vmem:[%s1104_s25 + $0x84] ss:$8 sps:$4 sm:$0xff]   ;;  %v981_v35 = vld [vmem:[%s1104_s25 + $0x80] ss:$8 sps:$4 sm:$0xff]  }
  0x23   : > { %678 = vmatpush1.bf16.msra.mxu1 %v946_v12  ;;  %638 = vmatprep.subr.bf16.mxu0 %v947_v13  ;;  %v976_v32 = vld [vmem:[%s1104_s25 + $0x170] ss:$8 sps:$4 sm:$0xff]   ;;  %v979_v34 = vld [vmem:[%s1104_s25 + $0x184] ss:$8 sps:$4 sm:$0xff]   ;;  %v982_v36 = vld [vmem:[%s1104_s25 + $0x180] ss:$8 sps:$4 sm:$0xff]  }
  0x24   : > { %679 = vmatprep.subr.bf16.mxu1 %v949_v14  ;;  %v983_v37 = vld [vmem:[%s1104_s25 + $0x94] ss:$8 sps:$4 sm:$0xff]   ;;  %v987_v39 = vld [vmem:[%s1104_s25 + $0x90] ss:$8 sps:$4 sm:$0xff]   ;;  %v989_v41 = vld [vmem:[%s1104_s25 + $0xa4] ss:$8 sps:$4 sm:$0xff]  }
  0x25   : > { %v985_v38 = vld [vmem:[%s1104_s25 + $0x194] ss:$8 sps:$4 sm:$0xff]   ;;  %v988_v40 = vld [vmem:[%s1104_s25 + $0x190] ss:$8 sps:$4 sm:$0xff]   ;;  %v991_v42 = vld [vmem:[%s1104_s25 + $0x1a4] ss:$8 sps:$4 sm:$0xff]  }
  0x26   : > { %639 = vmatpush1.bf16.msra.mxu0 %v951_v15  ;;  %v993_v43 = vld [vmem:[%s1104_s25 + $0xa0] ss:$8 sps:$4 sm:$0xff]   ;;  %v995_v45 = vld [vmem:[%s1104_s25 + $0xb4] ss:$8 sps:$4 sm:$0xff]   ;;  %v999_v50 = vld [vmem:[%s1104_s25 + $0xb0] ss:$8 sps:$4 sm:$0xff]  }
  0x27   : > { %680 = vmatpush1.bf16.msra.mxu1 %v952_v16  ;;  %640 = vmatprep.subr.bf16.mxu0 %v953_v17  ;;  %v994_v44 = vld [vmem:[%s1104_s25 + $0x1a0] ss:$8 sps:$4 sm:$0xff]   ;;  %v997_v46 = vld [vmem:[%s1104_s25 + $0x1b4] ss:$8 sps:$4 sm:$0xff]   ;;  %v1000_v51 = vld [vmem:[%s1104_s25 + $0x1b0] ss:$8 sps:$4 sm:$0xff]  }
  0x28   : > { %681 = vmatprep.subr.bf16.mxu1 %v955_v18  ;;  %v232_v47 = vld [vmem:[%s1099_s21] sm:$0xff]  ;;  %v233_v49 = vld [vmem:[%s1099_s21 + $0x8] sm:$0xff]  ;;  %v1007_v57 = vld [vmem:[%s1104_s25 + $0xd4] ss:$8 sps:$4 sm:$0xff]   ;;  %p899_p7 = scmp.ne.s32.totalorder %s1043_s12, 2 }
  0x29   : > { %v832_v48 = vcombine.high %v232_v47, %v232_v47  ;;  %v834_v52 = vcombine.high %v233_v49, %v233_v49  ;;  %v1001_v53 = vld [vmem:[%s1104_s25 + $0xc4] ss:$8 sps:$4 sm:$0xff]   ;;  %v1005_v55 = vld [vmem:[%s1104_s25 + $0xc0] ss:$8 sps:$4 sm:$0xff]   ;;  %v1009_v58 = vld [vmem:[%s1104_s25 + $0x1d4] ss:$8 sps:$4 sm:$0xff]   ;;  %v831_v5 = vcombine.low %v232_v47, %v232_v47  ;;  %v833_v6 = vcombine.low %v233_v49, %v233_v49 }
  0x2a   : > { %641 = vmatpush1.bf16.msra.mxu0 %v957_v19  ;;  %v1003_v54 = vld [vmem:[%s1104_s25 + $0x1c4] ss:$8 sps:$4 sm:$0xff]   ;;  %v1006_v56 = vld [vmem:[%s1104_s25 + $0x1c0] ss:$8 sps:$4 sm:$0xff]   ;;  %v1011_v59 = vld [vmem:[%s1104_s25 + $0xd0] ss:$8 sps:$4 sm:$0xff]  }
  0x2b   : > { %682 = vmatpush1.bf16.msra.mxu1 %v958_v20  ;;  %642 = vmatprep.subr.bf16.mxu0 %v959_v21  ;;  %v1012_v60 = vld [vmem:[%s1104_s25 + $0x1d0] ss:$8 sps:$4 sm:$0xff]   ;;  %v1013_v61 = vld [vmem:[%s1104_s25 + $0xe4] ss:$8 sps:$4 sm:$0xff]   ;;  %v1017_v63 = vld [vmem:[%s1104_s25 + $0xe0] ss:$8 sps:$4 sm:$0xff]   ;;  %v726_v21 = vlaneseq (!%p899_p7) }
  0x2c   : > { %683 = vmatprep.subr.bf16.mxu1 %v961_v22  ;;  %664 = vmatprep.mubr.bf16.mxu0 %v832_v48  ;;  %v1015_v62 = vld [vmem:[%s1104_s25 + $0x1e4] ss:$8 sps:$4 sm:$0xff]   ;;  %v1018_v0 = vld [vmem:[%s1104_s25 + $0x1e0] ss:$8 sps:$4 sm:$0xff]   ;;  %v1019_v1 = vld [vmem:[%s1104_s25 + $0xf4] ss:$8 sps:$4 sm:$0xff]  }
  0x2d   : > { %705 = vmatprep.mubr.bf16.mxu1 %v834_v52  ;;  %v1021_v2 = vld [vmem:[%s1104_s25 + $0x1f4] ss:$8 sps:$4 sm:$0xff]   ;;  %v1023_v3 = vld [vmem:[%s1104_s25 + $0xf0] ss:$8 sps:$4 sm:$0xff]   ;;  %v230_v8 = vld [vmem:[#allocation2] sm:$0xff]  ;;  %v727_v22 = vshrl.u32 (!%p899_p7), %v726_v21, 7 }
  0x2e   : > { %643 = vmatpush1.bf16.msra.mxu0 %v963_v23  ;;  %v1024_v4 = vld [vmem:[%s1104_s25 + $0x1f0] ss:$8 sps:$4 sm:$0xff]   ;;  %v231_v12 = vld [vmem:[#allocation2 + $0x8] sm:$0xff]  ;;  %v724_v23 = vld [vmem:[%s1194_s2] sm:$0x3] (!%p899_p7) }
  0x2f   : > { %684 = vmatpush1.bf16.msra.mxu1 %v964_v24  ;;  %644 = vmatprep.subr.bf16.mxu0 %v965_v25  ;;  %v728_v24 = vsub.s32 (!%p899_p7), 0, %v727_v22  ;;  %v732_v25 = vsub.s32 (!%p899_p7), 1, %v727_v22 }
  0x30   : > { %685 = vmatprep.subr.bf16.mxu1 %v967_v26 }
  0x32   : > { %645 = vmatpush1.bf16.msra.mxu0 %v969_v27 }
  0x33   : > { %686 = vmatpush1.bf16.msra.mxu1 %v970_v28  ;;  %646 = vmatprep.subr.bf16.mxu0 %v971_v29  ;;  %v729_v28 = vrot.slane (!%p899_p7), %v724_v23, %v728_v24  ;;  %v733_v29 = vrot.slane (!%p899_p7), %v724_v23, %v732_v25 }
  0x34   : > { %687 = vmatprep.subr.bf16.mxu1 %v973_v30 }
  0x36   : > { %647 = vmatpush1.bf16.msra.mxu0 %v975_v31 }
  0x37   : > { %688 = vmatpush1.bf16.msra.mxu1 %v976_v32  ;;  %648 = vmatprep.subr.bf16.mxu0 %v977_v33 }
  0x38   : > { %689 = vmatprep.subr.bf16.mxu1 %v979_v34 }
  0x3a   : > { %649 = vmatpush1.bf16.msra.mxu0 %v981_v35 }
  0x3b   : > { %690 = vmatpush1.bf16.msra.mxu1 %v982_v36  ;;  %650 = vmatprep.subr.bf16.mxu0 %v983_v37 }
  0x3c   : > { %691 = vmatprep.subr.bf16.mxu1 %v985_v38 }
  0x3e   : > { %651 = vmatpush1.bf16.msra.mxu0 %v987_v39 }
  0x3f   : > { %692 = vmatpush1.bf16.msra.mxu1 %v988_v40  ;;  %652 = vmatprep.subr.bf16.mxu0 %v989_v41 }
  0x40   : > { %693 = vmatprep.subr.bf16.mxu1 %v991_v42 }
  0x42   : > { %653 = vmatpush1.bf16.msra.mxu0 %v993_v43 }
  0x43   : > { %694 = vmatpush1.bf16.msra.mxu1 %v994_v44  ;;  %654 = vmatprep.subr.bf16.mxu0 %v995_v45 }
  0x44   : > { %695 = vmatprep.subr.bf16.mxu1 %v997_v46 }
  0x46   : > { %655 = vmatpush1.bf16.msra.mxu0 %v999_v50 }
  0x47   : > { %696 = vmatpush1.bf16.msra.mxu1 %v1000_v51  ;;  %656 = vmatprep.subr.bf16.mxu0 %v1001_v53 }
  0x48   : > { %697 = vmatprep.subr.bf16.mxu1 %v1003_v54 }
  0x4a   : > { %657 = vmatpush1.bf16.msra.mxu0 %v1005_v55 }
  0x4b   : > { %698 = vmatpush1.bf16.msra.mxu1 %v1006_v56  ;;  %658 = vmatprep.subr.bf16.mxu0 %v1007_v57 }
  0x4c   : > { %699 = vmatprep.subr.bf16.mxu1 %v1009_v58 }
  0x4e   : > { %659 = vmatpush1.bf16.msra.mxu0 %v1011_v59 }
  0x4f   : > { %700 = vmatpush1.bf16.msra.mxu1 %v1012_v60  ;;  %660 = vmatprep.subr.bf16.mxu0 %v1013_v61 }
  0x50   : > { %701 = vmatprep.subr.bf16.mxu1 %v1015_v62 }
  0x52   : > { %661 = vmatpush1.bf16.msra.mxu0 %v1017_v63 }
  0x53   : > { %702 = vmatpush1.bf16.msra.mxu1 %v1018_v0  ;;  %662 = vmatprep.subr.bf16.mxu0 %v1019_v1 }
  0x54   : > { %703 = vmatprep.subr.bf16.mxu1 %v1021_v2 }
  0x56   : > { %663 = vmatpush1.bf16.msra.mxu0 %v1023_v3 }
  0x57   : > { %704 = vmatpush1.bf16.msra.mxu1 %v1024_v4 }
  0x59   : > { %665 = vmatmul.mubr.bf16.vlgmr.msra.gmra.mrb[0].mxu0 %v831_v5 }
  0x5a   : > { %706 = vmatmul.mubr.bf16.vlgmr.msra.gmra.mrb[0].mxu1 %v833_v6 }
 0x12c   : > { %v666_v7 = vpop.f32.mrb[0].mxu0 }
 0x12d   : > { %v707_v9 = vpop.f32.mrb[0].mxu1  ;;  %v668_v11 = vpop.f32.mrb[1].mxu0  ;;  %721 = sbr.rel (%p899_p7) target bundleno = 320 (0x140), region = 40 }
 0x12e   : > { %v708_v10 = vadd.f32 %v707_v9, %v666_v7  ;;  %v709_v13 = vpop.f32.mrb[1].mxu1  ;;  %v670_v15 = vpop.f32.mrb[2].mxu0 }
 0x12f   : > { %v710_v14 = vadd.f32 %v709_v13, %v668_v11  ;;  %v711_v16 = vpop.f32.mrb[2].mxu1  ;;  %v671_v18 = vpop.f32.mrb[3].mxu0 }
 0x130   : > { %v714_v17 = vadd.f32 %v708_v10, %v230_v8  ;;  %v712_v19 = vpop.f32.mrb[3].mxu1 }
 0x131   : > { %v715_v20 = vadd.f32 %v710_v14, %v231_v12 }
 0x132   : > { %716 = vst [vmem:[#allocation2] sm:$0xff] %v714_v17 }
 0x133   : > { %717 = vst [vmem:[#allocation2 + $0x8] sm:$0xff] %v715_v20 }
 0x139   : > { %v722_v26 = vld [vmem:[#allocation2] sm:$0xff] }
 0x13a   : > { %v723_v27 = vld [vmem:[#allocation2 + $0x8] sm:$0xff]  ;;  %v736_v30 = vadd.f32 %v729_v28, %v722_v26 }
 0x13b   : > { %v737_v31 = vadd.f32 %v733_v29, %v723_v27 }
 0x13c   : > { %v738_v32 = vmax.f32 %v736_v30, 0.0 }
 0x13d   : > { %v739_v33 = vmax.f32 %v737_v31, 0.0 }
 0x13e   : > { %740 = vst [vmem:[%s1195_s3] sm:$0xff] %v738_v32 }
 0x13f   : > { %741 = vst [vmem:[%s1195_s3 + $0x8] sm:$0xff] %v739_v33 }
 0x140 PF: > { %s13_s14 = sadd.s32 1, %s1051_s14   ;;  %s1196_s12 = smov %s1047_s13 }
 0x141   : > { %p10_p8 = scmp.ge.s32.totalorder %s13_s14, 5   ;;  %s1197_s13 = smov %s1199_s15 }
 0x143   :  { %12 = sbr.rel (!%p10_p8) target bundleno = 2 (0x2), region = 73 }

// kernel: simple_depth_cnn_forward.11
= control target key start
LH: loop header
LB: loop body
LE: loop exit
PB: predicated region body
PF: predicated region fallthrough
CT: control target
= control target key end

     0   :  { %s1335_s1 = inlined_call_operand.vmem [shape: bf16[384,128], index: 1, kind: input, shape index: {}]   ;;  %s1336_s0 = inlined_call_operand.vmem [shape: bf16[128,384], index: 0, kind: input, shape index: {}]   ;;  %s1337_s2 = inlined_call_operand.vmem [shape: f32[1,128], index: 2, kind: input, shape index: {}]   ;;  %s1338_s3 = inlined_call_operand.vmem [shape: f32[128,128], index: 3, kind: output, shape index: {}]  }
   0x1   :  { %v964_v0 = vld [vmem:[%s1335_s1 + $0x40] sm:$0xff]   ;;  %v967_v3 = vld [vmem:[%s1335_s1 + $0x48] sm:$0xff]   ;;  %v970_v6 = vld [vmem:[%s1335_s1 + $0x50] sm:$0xff]  }
   0x2   :  { %v965_v1 = vld [vmem:[%s1335_s1] sm:$0xff]   ;;  %852 = vmatprep.subr.bf16.mxu0 %v964_v0  ;;  %v968_v4 = vld [vmem:[%s1335_s1 + $0x8] sm:$0xff]   ;;  %v971_v7 = vld [vmem:[%s1335_s1 + $0x10] sm:$0xff]  }
   0x3   :  { %v966_v2 = vld [vmem:[%s1335_s1 + $0x80] sm:$0xff]   ;;  %853 = vmatpush3.bf16.msra.mxu0 %v965_v1  ;;  %v969_v5 = vld [vmem:[%s1335_s1 + $0x88] sm:$0xff]   ;;  %v972_v8 = vld [vmem:[%s1335_s1 + $0x90] sm:$0xff]  }
   0x4   :  { %932 = vmatprep.subr.bf16.mxu1 %v966_v2  ;;  %854 = vmatprep.subr.bf16.mxu0 %v967_v3  ;;  %v973_v9 = vld [vmem:[%s1335_s1 + $0x58] sm:$0xff]   ;;  %v976_v12 = vld [vmem:[%s1335_s1 + $0x60] sm:$0xff]   ;;  %v979_v15 = vld [vmem:[%s1335_s1 + $0x68] sm:$0xff]  }
   0x5   :  { %933 = vmatpush3.bf16.msra.mxu1 %v966_v2  ;;  %v974_v10 = vld [vmem:[%s1335_s1 + $0x18] sm:$0xff]   ;;  %v978_v13 = vld [vmem:[%s1335_s1 + $0xa0] sm:$0xff]   ;;  %v981_v16 = vld [vmem:[%s1335_s1 + $0xa8] sm:$0xff]  }
   0x6   :  { %934 = vmatprep.subr.bf16.mxu1 %v969_v5  ;;  %v975_v11 = vld [vmem:[%s1335_s1 + $0x98] sm:$0xff]   ;;  %v977_v14 = vld [vmem:[%s1335_s1 + $0x20] sm:$0xff]   ;;  %v980_v17 = vld [vmem:[%s1335_s1 + $0x28] sm:$0xff]  }
   0x7   :  { %855 = vmatpush3.bf16.msra.mxu0 %v968_v4  ;;  %v982_v18 = vld [vmem:[%s1335_s1 + $0x70] sm:$0xff]   ;;  %v985_v21 = vld [vmem:[%s1335_s1 + $0x78] sm:$0xff]   ;;  %v988_v26 = vld [vmem:[%s1336_s0] ss:$12 sps:$4 sm:$0xff]  }
   0x8   :  { %856 = vmatprep.subr.bf16.mxu0 %v970_v6  ;;  %v983_v19 = vld [vmem:[%s1335_s1 + $0x30] sm:$0xff]   ;;  %v987_v22 = vld [vmem:[%s1335_s1 + $0xb8] sm:$0xff]   ;;  %v992_v28 = vld [vmem:[%s1336_s0 + $0x20] ss:$12 sps:$4 sm:$0xff]  }
   0x9   :  { %935 = vmatpush3.bf16.msra.mxu1 %v969_v5  ;;  %v984_v20 = vld [vmem:[%s1335_s1 + $0xb0] sm:$0xff]   ;;  %v986_v25 = vld [vmem:[%s1335_s1 + $0x38] sm:$0xff]   ;;  %v1008_v36 = vld [vmem:[%s1336_s0 + $0x80] ss:$12 sps:$4 sm:$0xff]  }
   0xa   :  { %936 = vmatprep.subr.bf16.mxu1 %v972_v8  ;;  %v990_v23 = vld [vmem:[%s1336_s0 + $0x4] ss:$12 sps:$4 sm:$0xff]   ;;  %v991_v24 = vld [vmem:[%s1336_s0 + $0x8] ss:$12 sps:$4 sm:$0xff]   ;;  %v1001_v35 = vld [vmem:[%s1336_s0 + $0x4c] ss:$12 sps:$4 sm:$0xff]  }
   0xb   :  { %857 = vmatpush3.bf16.msra.mxu0 %v971_v7  ;;  %435 = vmatprep.mubr.bf16.mxu0 %v990_v23  ;;  %v993_v27 = vld [vmem:[%s1336_s0 + $0x1c] ss:$12 sps:$4 sm:$0xff]   ;;  %v999_v29 = vld [vmem:[%s1336_s0 + $0x38] ss:$12 sps:$4 sm:$0xff]   ;;  %v996_v31 = vld [vmem:[%s1336_s0 + $0x34] ss:$12 sps:$4 sm:$0xff]  }
   0xc   :  { %858 = vmatprep.subr.bf16.mxu0 %v973_v9  ;;  %948 = vmatprep.mubr.bf16.mxu1 %v991_v24  ;;  %v995_v30 = vld [vmem:[%s1336_s0 + $0x18] ss:$12 sps:$4 sm:$0xff]   ;;  %v1000_v32 = vld [vmem:[%s1336_s0 + $0x50] ss:$12 sps:$4 sm:$0xff]   ;;  %v1007_v33 = vld [vmem:[%s1336_s0 + $0x68] ss:$12 sps:$4 sm:$0xff]  }
   0xd   :  { %937 = vmatpush3.bf16.msra.mxu1 %v972_v8  ;;  %v998_v34 = vld [vmem:[%s1336_s0 + $0x30] ss:$12 sps:$4 sm:$0xff]   ;;  %v1015_v37 = vld [vmem:[%s1336_s0 + $0x98] ss:$12 sps:$4 sm:$0xff]   ;;  %v1003_v38 = vld [vmem:[%s1336_s0 + $0x48] ss:$12 sps:$4 sm:$0xff]  }
   0xe   :  { %938 = vmatprep.subr.bf16.mxu1 %v975_v11  ;;  %v1004_v39 = vld [vmem:[%s1336_s0 + $0x64] ss:$12 sps:$4 sm:$0xff]   ;;  %v1006_v41 = vld [vmem:[%s1336_s0 + $0x60] ss:$12 sps:$4 sm:$0xff]   ;;  %v1009_v42 = vld [vmem:[%s1336_s0 + $0x7c] ss:$12 sps:$4 sm:$0xff]  }
   0xf   :  { %859 = vmatpush3.bf16.msra.mxu0 %v974_v10  ;;  %v1016_v40 = vld [vmem:[%s1336_s0 + $0xb0] ss:$12 sps:$4 sm:$0xff]   ;;  %v1011_v43 = vld [vmem:[%s1336_s0 + $0x78] ss:$12 sps:$4 sm:$0xff]   ;;  %v1012_v44 = vld [vmem:[%s1336_s0 + $0x94] ss:$12 sps:$4 sm:$0xff]  }
  0x10   :  { %860 = vmatprep.subr.bf16.mxu0 %v976_v12  ;;  %v1014_v45 = vld [vmem:[%s1336_s0 + $0x90] ss:$12 sps:$4 sm:$0xff]   ;;  %v1017_v46 = vld [vmem:[%s1336_s0 + $0xac] ss:$12 sps:$4 sm:$0xff]   ;;  %v1019_v47 = vld [vmem:[%s1336_s0 + $0xa8] ss:$12 sps:$4 sm:$0xff]  }
  0x11   :  { %939 = vmatpush3.bf16.msra.mxu1 %v975_v11  ;;  %v1251_v55 = vld [vmem:[%s1337_s2] ss:$0 sm:$0xff] }
  0x12   :  { %940 = vmatprep.subr.bf16.mxu1 %v978_v13 }
  0x13   :  { %861 = vmatpush3.bf16.msra.mxu0 %v977_v14 }
  0x14   :  { %862 = vmatprep.subr.bf16.mxu0 %v979_v15 }
  0x15   :  { %941 = vmatpush3.bf16.msra.mxu1 %v978_v13 }
  0x16   :  { %942 = vmatprep.subr.bf16.mxu1 %v981_v16 }
  0x17   :  { %863 = vmatpush3.bf16.msra.mxu0 %v980_v17 }
  0x18   :  { %864 = vmatprep.subr.bf16.mxu0 %v982_v18 }
  0x19   :  { %943 = vmatpush3.bf16.msra.mxu1 %v981_v16 }
  0x1a   :  { %944 = vmatprep.subr.bf16.mxu1 %v984_v20 }
  0x1b   :  { %865 = vmatpush3.bf16.msra.mxu0 %v983_v19 }
  0x1c   :  { %866 = vmatprep.subr.bf16.mxu0 %v985_v21 }
  0x1d   :  { %945 = vmatpush3.bf16.msra.mxu1 %v984_v20 }
  0x1e   :  { %946 = vmatprep.subr.bf16.mxu1 %v987_v22 }
  0x1f   :  { %867 = vmatpush3.bf16.msra.mxu0 %v986_v25 }
  0x21   :  { %947 = vmatpush3.bf16.msra.mxu1 %v987_v22 }
  0x22   :  { %436 = vmatmul.mubr.bf16.vlgmr.msra.gmra.mrb[0].mxu0 %v988_v26 }
  0x23   :  { %443 = vmatprep.mubr.bf16.mxu0 %v993_v27 }
  0x24   :  { %949 = vmatmul.mubr.bf16.vlgmr.msra.gmra.mrb[0].mxu1 %v992_v28 }
  0x25   :  { %952 = vmatprep.mubr.bf16.mxu1 %v999_v29 }
  0x2a   :  { %444 = vmatmul.mubr.bf16.gmra.mrb[4].mxu0 %v995_v30 }
  0x2b   :  { %451 = vmatprep.mubr.bf16.mxu0 %v996_v31 }
  0x2c   :  { %953 = vmatmul.mubr.bf16.gmra.mrb[4].mxu1 %v1000_v32 }
  0x2d   :  { %956 = vmatprep.mubr.bf16.mxu1 %v1007_v33 }
  0x32   :  { %452 = vmatmul.mubr.bf16.gmra.mrb[8].mxu0 %v998_v34 }
  0x33   :  { %459 = vmatprep.mubr.bf16.mxu0 %v1001_v35 }
  0x34   :  { %957 = vmatmul.mubr.bf16.gmra.mrb[8].mxu1 %v1008_v36 }
  0x35   :  { %960 = vmatprep.mubr.bf16.mxu1 %v1015_v37 }
  0x3a   :  { %460 = vmatmul.mubr.bf16.gmra.mrb[12].mxu0 %v1003_v38 }
  0x3b   :  { %467 = vmatprep.mubr.bf16.mxu0 %v1004_v39 }
  0x3c   :  { %961 = vmatmul.mubr.bf16.gmra.mrb[12].mxu1 %v1016_v40 }
  0x42   :  { %468 = vmatmul.mubr.bf16.gmra.mrb[16].mxu0 %v1006_v41 }
  0x43   :  { %475 = vmatprep.mubr.bf16.mxu0 %v1009_v42 }
  0x4a   :  { %476 = vmatmul.mubr.bf16.gmra.mrb[20].mxu0 %v1011_v43 }
  0x4b   :  { %483 = vmatprep.mubr.bf16.mxu0 %v1012_v44 }
  0x52   :  { %484 = vmatmul.mubr.bf16.gmra.mrb[24].mxu0 %v1014_v45 }
  0x53   :  { %491 = vmatprep.mubr.bf16.mxu0 %v1017_v46 }
  0x5a   :  { %492 = vmatmul.mubr.bf16.gmra.mrb[28].mxu0 %v1019_v47 }
  0xf5   :  { %v868_v48 = vpop.f32.mrb[0].mxu0 }
  0xf6   :  { %v869_v49 = vpop.f32.mrb[1].mxu0 }
  0xf7   :  { %v870_v50 = vadd.f32 %v869_v49, %v868_v48  ;;  %v871_v51 = vpop.f32.mrb[2].mxu0  ;;  %v950_v52 = vpop.f32.mrb[0].mxu1 }
  0xf8   :  { %v872_v53 = vpop.f32.mrb[3].mxu0  ;;  %v534_v54 = vpop.f32.mrb[1].mxu1 }
  0xf9   :  { %v873_v56 = vadd.f32 %v872_v53, %v871_v51  ;;  %v535_v57 = vadd.f32 %v870_v50, %v534_v54  ;;  %v951_v58 = vpop.f32.mrb[2].mxu1 }
  0xfa   :  { %v537_v59 = vpop.f32.mrb[3].mxu1 }
  0xfb   :  { %v655_v60 = vadd.f32 %v1251_v55, %v535_v57  ;;  %v538_v61 = vadd.f32 %v873_v56, %v537_v59 }
  0xfd   :  { %v836_v62 = vmul.f32 -1.442695, %v655_v60  ;;  %v656_v63 = vadd.f32 %v1251_v55, %v538_v61  ;;  %v874_v0 = vpop.f32.mrb[4].mxu0 }
  0xfe   :  { %v875_v1 = vpop.f32.mrb[5].mxu0 }
  0xff   :  { %1020 = vpow2.f32 %v836_v62  ;;  %v837_v2 = vmul.f32 -1.442695, %v656_v63  ;;  %v876_v3 = vadd.f32 %v875_v1, %v874_v0  ;;  %v877_v4 = vpop.f32.mrb[6].mxu0  ;;  %v954_v5 = vpop.f32.mrb[4].mxu1 }
 0x100   :  { %v878_v6 = vpop.f32.mrb[7].mxu0  ;;  %v550_v7 = vpop.f32.mrb[5].mxu1 }
 0x101   :  { %1022 = vpow2.f32 %v837_v2  ;;  %v543_v8 = vadd.f32 %v950_v52, %v876_v3  ;;  %v879_v9 = vadd.f32 %v878_v6, %v877_v4  ;;  %v955_v10 = vpop.f32.mrb[6].mxu1 }
 0x102   :  { %v553_v11 = vpop.f32.mrb[7].mxu1 }
 0x103   :  { %v657_v12 = vadd.f32 %v1251_v55, %v543_v8  ;;  %v546_v13 = vadd.f32 %v951_v58, %v879_v9 }
 0x105   :  { %v838_v14 = vmul.f32 -1.442695, %v657_v12  ;;  %v658_v15 = vadd.f32 %v1251_v55, %v546_v13  ;;  %v880_v16 = vpop.f32.mrb[8].mxu0 }
 0x106   :  { %v881_v17 = vpop.f32.mrb[9].mxu0 }
 0x107   :  { %1024 = vpow2.f32 %v838_v14  ;;  %v839_v18 = vmul.f32 -1.442695, %v658_v15  ;;  %v882_v19 = vadd.f32 %v881_v17, %v880_v16  ;;  %v883_v20 = vpop.f32.mrb[10].mxu0  ;;  %v1257_v21 = vpop.f32.mrb[8].mxu1 }
 0x108   :  { %v884_v22 = vpop.f32.mrb[11].mxu0  ;;  %v566_v23 = vpop.f32.mrb[9].mxu1 }
 0x109   :  { %v1021_v24 = vpop.eup %1020  ;;  %1026 = vpow2.f32 %v839_v18  ;;  %v885_v25 = vadd.f32 %v884_v22, %v883_v20  ;;  %v551_v26 = vadd.f32 %v882_v19, %v550_v7  ;;  %v1259_v27 = vpop.f32.mrb[10].mxu1 }
 0x10a   :  { %v719_v28 = vadd.f32 1.0, %v1021_v24  ;;  %v569_v29 = vpop.f32.mrb[11].mxu1 }
 0x10b   :  { %v1023_v30 = vpop.eup %1022  ;;  %v659_v31 = vadd.f32 %v1251_v55, %v551_v26  ;;  %v554_v32 = vadd.f32 %v885_v25, %v553_v11 }
 0x10c   :  { %1028 = vrcp.f32 %v719_v28  ;;  %v720_v33 = vadd.f32 1.0, %v1023_v30 }
 0x10d   :  { %v840_v34 = vmul.f32 -1.442695, %v659_v31  ;;  %v660_v35 = vadd.f32 %v1251_v55, %v554_v32  ;;  %v886_v36 = vpop.f32.mrb[12].mxu0 }
 0x10e   :  { %1030 = vrcp.f32 %v720_v33  ;;  %v887_v37 = vpop.f32.mrb[13].mxu0 }
 0x10f   :  { %1032 = vpow2.f32 %v840_v34  ;;  %v841_v38 = vmul.f32 -1.442695, %v660_v35  ;;  %v888_v39 = vadd.f32 %v887_v37, %v886_v36  ;;  %v889_v40 = vpop.f32.mrb[14].mxu0  ;;  %v1263_v41 = vpop.f32.mrb[12].mxu1 }
 0x110   :  { %v890_v42 = vpop.f32.mrb[15].mxu0  ;;  %v1265_v43 = vpop.f32.mrb[13].mxu1 }
 0x111   :  { %v1025_v44 = vpop.eup %1024  ;;  %1034 = vpow2.f32 %v841_v38  ;;  %v559_v45 = vadd.f32 %v954_v5, %v888_v39  ;;  %v891_v46 = vadd.f32 %v890_v42, %v889_v40  ;;  %v1267_v47 = vpop.f32.mrb[14].mxu1 }
 0x112   :  { %v721_v48 = vadd.f32 1.0, %v1025_v44  ;;  %v1269_v49 = vpop.f32.mrb[15].mxu1 }
 0x113   :  { %v1027_v50 = vpop.eup %1026  ;;  %v661_v51 = vadd.f32 %v1251_v55, %v559_v45  ;;  %v562_v52 = vadd.f32 %v955_v10, %v891_v46 }
 0x114   :  { %1036 = vrcp.f32 %v721_v48  ;;  %v722_v53 = vadd.f32 1.0, %v1027_v50 }
 0x115   :  { %v842_v54 = vmul.f32 -1.442695, %v661_v51  ;;  %v662_v56 = vadd.f32 %v1251_v55, %v562_v52  ;;  %v892_v57 = vpop.f32.mrb[16].mxu0 }
 0x116   :  { %v1029_v58 = vpop.eup %1028  ;;  %1038 = vrcp.f32 %v722_v53  ;;  %v893_v59 = vpop.f32.mrb[17].mxu0 }
 0x117   :  { %767 = vst [vmem:[%s1338_s3] sm:$0xff] %v1029_v58  ;;  %1040 = vpow2.f32 %v842_v54  ;;  %v843_v60 = vmul.f32 -1.442695, %v662_v56  ;;  %v894_v61 = vadd.f32 %v893_v59, %v892_v57  ;;  %v895_v62 = vpop.f32.mrb[18].mxu0 }
 0x118   :  { %v1031_v63 = vpop.eup %1030  ;;  %v896_v0 = vpop.f32.mrb[19].mxu0 }
 0x119   :  { %v1033_v1 = vpop.eup %1032  ;;  %768 = vst [vmem:[%s1338_s3 + $0x8] sm:$0xff] %v1031_v63  ;;  %1042 = vpow2.f32 %v843_v60  ;;  %v897_v2 = vadd.f32 %v896_v0, %v895_v62  ;;  %v567_v3 = vadd.f32 %v894_v61, %v566_v23 }
 0x11a   :  { %v723_v4 = vadd.f32 1.0, %v1033_v1 }
 0x11b   :  { %v1035_v5 = vpop.eup %1034  ;;  %v663_v6 = vadd.f32 %v1251_v55, %v567_v3  ;;  %v570_v7 = vadd.f32 %v897_v2, %v569_v29 }
 0x11c   :  { %1044 = vrcp.f32 %v723_v4  ;;  %v724_v8 = vadd.f32 1.0, %v1035_v5 }
 0x11d   :  { %v844_v9 = vmul.f32 -1.442695, %v663_v6  ;;  %v664_v10 = vadd.f32 %v1251_v55, %v570_v7  ;;  %v898_v11 = vpop.f32.mrb[20].mxu0 }
 0x11e   :  { %v1037_v12 = vpop.eup %1036  ;;  %1046 = vrcp.f32 %v724_v8  ;;  %v899_v13 = vpop.f32.mrb[21].mxu0 }
 0x11f   :  { %769 = vst [vmem:[%s1338_s3 + $0x10] sm:$0xff] %v1037_v12  ;;  %1048 = vpow2.f32 %v844_v9  ;;  %v845_v14 = vmul.f32 -1.442695, %v664_v10  ;;  %v900_v15 = vadd.f32 %v899_v13, %v898_v11  ;;  %v901_v16 = vpop.f32.mrb[22].mxu0 }
 0x120   :  { %v1039_v17 = vpop.eup %1038  ;;  %v902_v18 = vpop.f32.mrb[23].mxu0 }
 0x121   :  { %v1041_v19 = vpop.eup %1040  ;;  %770 = vst [vmem:[%s1338_s3 + $0x18] sm:$0xff] %v1039_v17  ;;  %1050 = vpow2.f32 %v845_v14  ;;  %v575_v20 = vadd.f32 %v1257_v21, %v900_v15  ;;  %v903_v22 = vadd.f32 %v902_v18, %v901_v16 }
 0x122   :  { %v725_v23 = vadd.f32 1.0, %v1041_v19 }
 0x123   :  { %v1043_v24 = vpop.eup %1042  ;;  %v665_v25 = vadd.f32 %v1251_v55, %v575_v20  ;;  %v578_v26 = vadd.f32 %v1259_v27, %v903_v22 }
 0x124   :  { %1052 = vrcp.f32 %v725_v23  ;;  %v726_v28 = vadd.f32 1.0, %v1043_v24 }
 0x125   :  { %v846_v29 = vmul.f32 -1.442695, %v665_v25  ;;  %v666_v30 = vadd.f32 %v1251_v55, %v578_v26  ;;  %v904_v31 = vpop.f32.mrb[24].mxu0 }
 0x126   :  { %v1045_v32 = vpop.eup %1044  ;;  %1054 = vrcp.f32 %v726_v28  ;;  %v905_v33 = vpop.f32.mrb[25].mxu0 }
 0x127   :  { %771 = vst [vmem:[%s1338_s3 + $0x20] sm:$0xff] %v1045_v32  ;;  %1056 = vpow2.f32 %v846_v29  ;;  %v847_v21 = vmul.f32 -1.442695, %v666_v30  ;;  %v906_v34 = vadd.f32 %v905_v33, %v904_v31  ;;  %v907_v35 = vpop.f32.mrb[26].mxu0 }
 0x128   :  { %v1047_v36 = vpop.eup %1046  ;;  %v908_v37 = vpop.f32.mrb[27].mxu0 }
 0x129   :  { %v1049_v27 = vpop.eup %1048  ;;  %772 = vst [vmem:[%s1338_s3 + $0x28] sm:$0xff] %v1047_v36  ;;  %1058 = vpow2.f32 %v847_v21  ;;  %v909_v38 = vadd.f32 %v908_v37, %v907_v35  ;;  %v583_v39 = vadd.f32 %v906_v34, %v1265_v43 }
 0x12a   :  { %v727_v40 = vadd.f32 1.0, %v1049_v27 }
 0x12b   :  { %v1051_v42 = vpop.eup %1050  ;;  %v667_v44 = vadd.f32 %v1251_v55, %v583_v39  ;;  %v586_v45 = vadd.f32 %v909_v38, %v1269_v49 }
 0x12c   :  { %1060 = vrcp.f32 %v727_v40  ;;  %v728_v46 = vadd.f32 1.0, %v1051_v42 }
 0x12d   :  { %v848_v48 = vmul.f32 -1.442695, %v667_v44  ;;  %v668_v50 = vadd.f32 %v1251_v55, %v586_v45  ;;  %v910_v51 = vpop.f32.mrb[28].mxu0 }
 0x12e   :  { %v1053_v52 = vpop.eup %1052  ;;  %1062 = vrcp.f32 %v728_v46  ;;  %v911_v53 = vpop.f32.mrb[29].mxu0 }
 0x12f   :  { %773 = vst [vmem:[%s1338_s3 + $0x30] sm:$0xff] %v1053_v52  ;;  %1064 = vpow2.f32 %v848_v48  ;;  %v849_v43 = vmul.f32 -1.442695, %v668_v50  ;;  %v912_v54 = vadd.f32 %v911_v53, %v910_v51  ;;  %v913_v56 = vpop.f32.mrb[30].mxu0 }
 0x130   :  { %v1055_v57 = vpop.eup %1054  ;;  %v914_v58 = vpop.f32.mrb[31].mxu0 }
 0x131   :  { %v1057_v49 = vpop.eup %1056  ;;  %774 = vst [vmem:[%s1338_s3 + $0x38] sm:$0xff] %v1055_v57  ;;  %1066 = vpow2.f32 %v849_v43  ;;  %v591_v59 = vadd.f32 %v1263_v41, %v912_v54  ;;  %v915_v60 = vadd.f32 %v914_v58, %v913_v56 }
 0x132   :  { %v729_v61 = vadd.f32 1.0, %v1057_v49 }
 0x133   :  { %v1059_v62 = vpop.eup %1058  ;;  %v669_v63 = vadd.f32 %v1251_v55, %v591_v59  ;;  %v594_v0 = vadd.f32 %v1267_v47, %v915_v60 }
 0x134   :  { %1068 = vrcp.f32 %v729_v61  ;;  %v730_v1 = vadd.f32 1.0, %v1059_v62 }
 0x135   :  { %v850_v2 = vmul.f32 -1.442695, %v669_v63  ;;  %v670_v3 = vadd.f32 %v1251_v55, %v594_v0 }
 0x136   :  { %v1061_v4 = vpop.eup %1060  ;;  %1070 = vrcp.f32 %v730_v1 }
 0x137   :  { %775 = vst [vmem:[%s1338_s3 + $0x40] sm:$0xff] %v1061_v4  ;;  %1072 = vpow2.f32 %v850_v2  ;;  %v851_v41 = vmul.f32 -1.442695, %v670_v3 }
 0x138   :  { %v1063_v5 = vpop.eup %1062 }
 0x139   :  { %v1065_v6 = vpop.eup %1064  ;;  %776 = vst [vmem:[%s1338_s3 + $0x48] sm:$0xff] %v1063_v5  ;;  %1074 = vpow2.f32 %v851_v41 }
 0x13a   :  { %v731_v47 = vadd.f32 1.0, %v1065_v6 }
 0x13b   :  { %v1067_v7 = vpop.eup %1066 }
 0x13c   :  { %1076 = vrcp.f32 %v731_v47  ;;  %v732_v8 = vadd.f32 1.0, %v1067_v7 }
 0x13e   :  { %v1069_v55 = vpop.eup %1068  ;;  %1078 = vrcp.f32 %v732_v8 }
 0x13f   :  { %777 = vst [vmem:[%s1338_s3 + $0x50] sm:$0xff] %v1069_v55 }
 0x140   :  { %v1071_v9 = vpop.eup %1070 }
 0x141   :  { %v1073_v10 = vpop.eup %1072  ;;  %778 = vst [vmem:[%s1338_s3 + $0x58] sm:$0xff] %v1071_v9 }
 0x142   :  { %v733_v11 = vadd.f32 1.0, %v1073_v10 }
 0x143   :  { %v1075_v12 = vpop.eup %1074 }
 0x144   :  { %1080 = vrcp.f32 %v733_v11  ;;  %v734_v13 = vadd.f32 1.0, %v1075_v12 }
 0x146   :  { %v1077_v14 = vpop.eup %1076  ;;  %1082 = vrcp.f32 %v734_v13 }
 0x147   :  { %779 = vst [vmem:[%s1338_s3 + $0x60] sm:$0xff] %v1077_v14 }
 0x148   :  { %v1079_v15 = vpop.eup %1078 }
 0x149   :  { %780 = vst [vmem:[%s1338_s3 + $0x68] sm:$0xff] %v1079_v15 }
 0x14e   :  { %v1081_v16 = vpop.eup %1080 }
 0x14f   :  { %781 = vst [vmem:[%s1338_s3 + $0x70] sm:$0xff] %v1081_v16 }
 0x150   :  { %v1083_v17 = vpop.eup %1082 }
 0x151   :  { %782 = vst [vmem:[%s1338_s3 + $0x78] sm:$0xff] %v1083_v17 }

</bundles_post_ra>
